<compile_context>
chip_gen: v6e
topology: v6e:2x2x1
jax: 0.10.0
libtpu: 0.0.40
codegen_flags: <defaults>
</compile_context>

<pallas_src>
import jax
import jax.numpy as jnp
from jax.experimental import pallas as pl
from jax.experimental.pallas import tpu as pltpu

NUM_CLASSES = 3
GATE_BLK = 128   # lanes per gate block (i, f, g, o)
HP = 128         # padded hidden size (lane-aligned h/c)
CP = 128         # padded class dim (lane-dense output slab)


def rnn_classifier_kernel(x_ref, w_ih_ref, w_hh_ref, b_ref,
                          w_fc_ref, b_fc_ref, out_ref):
    """LSTM recurrence over T steps + FC + log_softmax, fully VMEM-resident.

    x_ref   : (T, Bp, 1)        time-major input, batch padded to 8 sublanes
    w_ih_ref: (1, 4*GATE_BLK)   input->gate weights, gate-block padded,
                                i/f/o columns pre-scaled by 0.5
    w_hh_ref: (HP, 4*GATE_BLK)  hidden->gate weights, same layout / scaling
    b_ref   : (1, 4*GATE_BLK)   b_ih + b_hh, same layout / scaling
    w_fc_ref: (HP, CP)          classifier weights (zero-padded)
    b_fc_ref: (1, CP)           classifier bias (padded classes = -1e30)
    out_ref : (Bp, CP)          lane-dense log-prob slab (first 3 lanes valid)

    Padded gate lanes have zero weights & bias, so for padded lanes
    i=f=o=0.5, g=0 -> c and h stay exactly 0 through the recurrence.
    """
    T, Bp, _ = x_ref.shape
    Hp = w_hh_ref.shape[0]
    G = w_hh_ref.shape[1] // 4          # == GATE_BLK

    w_hh = w_hh_ref[...]                # stays resident across the recurrence

    # Hoisted input projection: one vectorized pre-pass over all timesteps.
    # (T, Bp, 1) * (1, 4G) + (1, 4G) -> (T, Bp, 4G)
    x_proj = x_ref[...] * w_ih_ref[...] + b_ref[...]

    h = jnp.zeros((Bp, Hp), jnp.float32)
    c = jnp.zeros((Bp, Hp), jnp.float32)

    # Fully-unrolled recurrence (T is small and static).
    for t in range(T):
        gates = x_proj[t] + jnp.dot(h, w_hh, preferred_element_type=jnp.float32)
        tg = jnp.tanh(gates)            # single EUP pass over the whole slab
        # i/f/o pre-activations were halved at pack time, so
        # sigmoid(z) = 0.5 * (1 + tanh(z/2)); g columns are plain tanh(z).
        i_g = 0.5 * (1.0 + tg[:, 0 * G:1 * G])
        f_g = 0.5 * (1.0 + tg[:, 1 * G:2 * G])
        g_g = tg[:, 2 * G:3 * G]
        o_g = 0.5 * (1.0 + tg[:, 3 * G:4 * G])
        c = f_g * c + i_g * g_g
        h = o_g * jnp.tanh(c)

    # Classifier + numerically stable log_softmax.  Padded class lanes carry a
    # -1e30 bias, so they contribute nothing to the max or the logsumexp.
    logits = (jnp.dot(h, w_fc_ref[...], preferred_element_type=jnp.float32)
              + b_fc_ref[...])
    m = jnp.max(logits, axis=-1, keepdims=True)
    shifted = logits - m
    lse = jnp.log(jnp.sum(jnp.exp(shifted), axis=-1, keepdims=True))
    out_ref[...] = shifted - lse


def init_params(key, hidden_size=10):
    """PyTorch-shaped parameters for nn.LSTM(1, H, batch_first=True) + nn.Linear(H, 3)."""
    H = hidden_size
    k = 1.0 / jnp.sqrt(jnp.float32(H))
    keys = jax.random.split(key, 6)
    return {
        "w_ih": jax.random.uniform(keys[0], (4 * H, 1), jnp.float32, -k, k),
        "w_hh": jax.random.uniform(keys[1], (4 * H, H), jnp.float32, -k, k),
        "b_ih": jax.random.uniform(keys[2], (4 * H,), jnp.float32, -k, k),
        "b_hh": jax.random.uniform(keys[3], (4 * H,), jnp.float32, -k, k),
        "w_fc": jax.random.uniform(keys[4], (3, H), jnp.float32, -k, k),
        "b_fc": jax.random.uniform(keys[5], (3,), jnp.float32, -k, k),
    }


def pack_params(params):
    """Pad / transpose / scale parameters into the kernel's lane-aligned layout."""
    H = params["w_hh"].shape[1]
    b_sum = params["b_ih"] + params["b_hh"]
    # PyTorch gate order along 4H: (i, f, g, o).  i/f/o pre-activations get a
    # 0.5 scale so the kernel can use sigmoid(z) = 0.5*(1 + tanh(z/2)).
    gate_scale = (0.5, 0.5, 1.0, 0.5)

    w_ih_p = jnp.zeros((1, 4 * GATE_BLK), jnp.float32)
    w_hh_p = jnp.zeros((HP, 4 * GATE_BLK), jnp.float32)
    b_p = jnp.zeros((1, 4 * GATE_BLK), jnp.float32)
    for g, s in enumerate(gate_scale):
        rows = slice(g * H, (g + 1) * H)
        cols = slice(g * GATE_BLK, g * GATE_BLK + H)
        w_ih_p = w_ih_p.at[0, cols].set(s * params["w_ih"][rows, 0])
        w_hh_p = w_hh_p.at[:H, cols].set(s * params["w_hh"][rows, :].T)
        b_p = b_p.at[0, cols].set(s * b_sum[rows])

    w_fc_p = (jnp.zeros((HP, CP), jnp.float32)
              .at[:H, :NUM_CLASSES].set(params["w_fc"].T))
    b_fc_p = (jnp.full((1, CP), -1e30, jnp.float32)
              .at[0, :NUM_CLASSES].set(params["b_fc"]))
    return {"w_ih": w_ih_p, "w_hh": w_hh_p, "b": b_p,
            "w_fc": w_fc_p, "b_fc": b_fc_p}


def rnn_classifier_forward(x, packed):
    """x: (B, T, 1) float32 -> (B, 3) log-probs."""
    B, T, _ = x.shape
    Bp = ((B + 7) // 8) * 8                       # pad batch to full sublanes
    x_tm = jnp.transpose(x, (1, 0, 2))            # (T, B, 1) time-major
    x_tm = jnp.pad(x_tm, ((0, 0), (0, Bp - B), (0, 0)))

    vmem = pl.BlockSpec(memory_space=pltpu.MemorySpace.VMEM)
    out_p = pl.pallas_call(
        rnn_classifier_kernel,
        out_shape=jax.ShapeDtypeStruct((Bp, CP), jnp.float32),
        in_specs=[vmem] * 6,
        out_specs=vmem,
    )(x_tm, packed["w_ih"], packed["w_hh"], packed["b"],
      packed["w_fc"], packed["b_fc"])
    # TODO(synk): add a batch grid with dimension_semantics=("parallel",) if B
    # is ever scaled up (2 TensorCores on v7x); flat call is best at B=2.
    return out_p[:B, :NUM_CLASSES]


def reference_forward(x, params):
    """Pure-JAX reference with PyTorch nn.LSTM semantics (unpadded, unscaled)."""
    B, T, _ = x.shape
    H = params["w_hh"].shape[1]
    w_ih_t = params["w_ih"].T                     # (1, 4H)
    w_hh_t = params["w_hh"].T                     # (H, 4H)
    b = (params["b_ih"] + params["b_hh"])[None, :]
    h = jnp.zeros((B, H), jnp.float32)
    c = jnp.zeros((B, H), jnp.float32)
    for t in range(T):
        gates = x[:, t, :] @ w_ih_t + h @ w_hh_t + b
        i_g = jax.nn.sigmoid(gates[:, 0 * H:1 * H])
        f_g = jax.nn.sigmoid(gates[:, 1 * H:2 * H])
        g_g = jnp.tanh(gates[:, 2 * H:3 * H])
        o_g = jax.nn.sigmoid(gates[:, 3 * H:4 * H])
        c = f_g * c + i_g * g_g
        h = o_g * jnp.tanh(c)
    logits = h @ params["w_fc"].T + params["b_fc"][None, :]
    return jax.nn.log_softmax(logits, axis=-1)


if __name__ == "__main__":
    B, T, H = 2, 8, 10  # batch, seq_len, hidden_size (module default)
    key = jax.random.PRNGKey(0)
    k_x, k_p = jax.random.split(key)

    x = jax.random.normal(k_x, (B, T, 1), jnp.float32)
    params = init_params(k_p, hidden_size=H)
    packed = pack_params(params)

    out = rnn_classifier_forward(x, packed)
    out = jax.block_until_ready(out)

    ref = reference_forward(x, params)
    assert out.shape == (B, NUM_CLASSES)
    assert jnp.allclose(out, ref, atol=1e-4, rtol=1e-4), "mismatch vs reference"

    print("KERNEL_OK")
</pallas_src>

<mosaic_0001>
module attributes {stable_mosaic.version = 11 : i64} {
  func.func @rnn_classifier_kernel(%arg0: memref<8x8x1xf32, #tpu.memory_space<vmem>>, %arg1: memref<1x512xf32, #tpu.memory_space<vmem>>, %arg2: memref<128x512xf32, #tpu.memory_space<vmem>>, %arg3: memref<1x512xf32, #tpu.memory_space<vmem>>, %arg4: memref<128x128xf32, #tpu.memory_space<vmem>>, %arg5: memref<1x128xf32, #tpu.memory_space<vmem>>, %arg6: memref<8x128xf32, #tpu.memory_space<vmem>>) attributes {dimension_semantics = [], scalar_prefetch = 0 : i64, scratch_operands = 0 : i64, tpu.core_type = #tpu.core_type<tc>} {
    %c0 = arith.constant 0 : index
    %c0_0 = arith.constant 0 : index
    %0 = vector.load %arg2[%c0, %c0_0] : memref<128x512xf32, #tpu.memory_space<vmem>>, vector<128x512xf32>
    %c0_1 = arith.constant 0 : index
    %c0_2 = arith.constant 0 : index
    %c0_3 = arith.constant 0 : index
    %1 = vector.load %arg0[%c0_1, %c0_2, %c0_3] : memref<8x8x1xf32, #tpu.memory_space<vmem>>, vector<8x8x1xf32>
    %c0_4 = arith.constant 0 : index
    %c0_5 = arith.constant 0 : index
    %2 = vector.load %arg1[%c0_4, %c0_5] : memref<1x512xf32, #tpu.memory_space<vmem>>, vector<1x512xf32>
    %3 = vector.shape_cast %2 : vector<1x512xf32> to vector<1x1x512xf32>
    %4 = vector.broadcast %1 : vector<8x8x1xf32> to vector<8x8x512xf32>
    %5 = vector.broadcast %3 : vector<1x1x512xf32> to vector<8x8x512xf32>
    %6 = arith.mulf %4, %5 : vector<8x8x512xf32>
    %c0_6 = arith.constant 0 : index
    %c0_7 = arith.constant 0 : index
    %7 = vector.load %arg3[%c0_6, %c0_7] : memref<1x512xf32, #tpu.memory_space<vmem>>, vector<1x512xf32>
    %8 = vector.shape_cast %7 : vector<1x512xf32> to vector<1x1x512xf32>
    %9 = vector.broadcast %8 : vector<1x1x512xf32> to vector<8x8x512xf32>
    %10 = arith.addf %6, %9 : vector<8x8x512xf32>
    %cst = arith.constant 0.000000e+00 : f32
    %11 = vector.broadcast %cst : f32 to vector<8x128xf32>
    %cst_8 = arith.constant 0.000000e+00 : f32
    %12 = vector.broadcast %cst_8 : f32 to vector<8x128xf32>
    %13 = vector.extract_strided_slice %10 {offsets = [0, 0, 0], sizes = [1, 8, 512], strides = [1, 1, 1]} : vector<8x8x512xf32> to vector<1x8x512xf32>
    %14 = vector.shape_cast %13 : vector<1x8x512xf32> to vector<8x512xf32>
    %cst_9 = arith.constant dense<0.000000e+00> : vector<8x512xf32>
    %15 = tpu.matmul %11, %0, %cst_9 {dimension_numbers = #tpu.dot_dimension_numbers<[1], [0], [0], [1], [0, 0, 1, 1], [], []>} : vector<8x128xf32>, vector<128x512xf32>, vector<8x512xf32> -> vector<8x512xf32>
    %16 = arith.addf %14, %15 : vector<8x512xf32>
    %17 = math.tanh %16 : vector<8x512xf32>
    %18 = vector.extract_strided_slice %17 {offsets = [0, 0], sizes = [8, 128], strides = [1, 1]} : vector<8x512xf32> to vector<8x128xf32>
    %cst_10 = arith.constant 1.000000e+00 : f32
    %19 = vector.broadcast %cst_10 : f32 to vector<8x128xf32>
    %20 = arith.addf %19, %18 : vector<8x128xf32>
    %cst_11 = arith.constant 5.000000e-01 : f32
    %21 = vector.broadcast %cst_11 : f32 to vector<8x128xf32>
    %22 = arith.mulf %21, %20 : vector<8x128xf32>
    %23 = vector.extract_strided_slice %17 {offsets = [0, 128], sizes = [8, 128], strides = [1, 1]} : vector<8x512xf32> to vector<8x128xf32>
    %cst_12 = arith.constant 1.000000e+00 : f32
    %24 = vector.broadcast %cst_12 : f32 to vector<8x128xf32>
    %25 = arith.addf %24, %23 : vector<8x128xf32>
    %cst_13 = arith.constant 5.000000e-01 : f32
    %26 = vector.broadcast %cst_13 : f32 to vector<8x128xf32>
    %27 = arith.mulf %26, %25 : vector<8x128xf32>
    %28 = vector.extract_strided_slice %17 {offsets = [0, 256], sizes = [8, 128], strides = [1, 1]} : vector<8x512xf32> to vector<8x128xf32>
    %29 = vector.extract_strided_slice %17 {offsets = [0, 384], sizes = [8, 128], strides = [1, 1]} : vector<8x512xf32> to vector<8x128xf32>
    %cst_14 = arith.constant 1.000000e+00 : f32
    %30 = vector.broadcast %cst_14 : f32 to vector<8x128xf32>
    %31 = arith.addf %30, %29 : vector<8x128xf32>
    %cst_15 = arith.constant 5.000000e-01 : f32
    %32 = vector.broadcast %cst_15 : f32 to vector<8x128xf32>
    %33 = arith.mulf %32, %31 : vector<8x128xf32>
    %34 = arith.mulf %27, %12 : vector<8x128xf32>
    %35 = arith.mulf %22, %28 : vector<8x128xf32>
    %36 = arith.addf %34, %35 : vector<8x128xf32>
    %37 = math.tanh %36 : vector<8x128xf32>
    %38 = arith.mulf %33, %37 : vector<8x128xf32>
    %39 = vector.extract_strided_slice %10 {offsets = [1, 0, 0], sizes = [1, 8, 512], strides = [1, 1, 1]} : vector<8x8x512xf32> to vector<1x8x512xf32>
    %40 = vector.shape_cast %39 : vector<1x8x512xf32> to vector<8x512xf32>
    %cst_16 = arith.constant dense<0.000000e+00> : vector<8x512xf32>
    %41 = tpu.matmul %38, %0, %cst_16 {dimension_numbers = #tpu.dot_dimension_numbers<[1], [0], [0], [1], [0, 0, 1, 1], [], []>} : vector<8x128xf32>, vector<128x512xf32>, vector<8x512xf32> -> vector<8x512xf32>
    %42 = arith.addf %40, %41 : vector<8x512xf32>
    %43 = math.tanh %42 : vector<8x512xf32>
    %44 = vector.extract_strided_slice %43 {offsets = [0, 0], sizes = [8, 128], strides = [1, 1]} : vector<8x512xf32> to vector<8x128xf32>
    %cst_17 = arith.constant 1.000000e+00 : f32
    %45 = vector.broadcast %cst_17 : f32 to vector<8x128xf32>
    %46 = arith.addf %45, %44 : vector<8x128xf32>
    %cst_18 = arith.constant 5.000000e-01 : f32
    %47 = vector.broadcast %cst_18 : f32 to vector<8x128xf32>
    %48 = arith.mulf %47, %46 : vector<8x128xf32>
    %49 = vector.extract_strided_slice %43 {offsets = [0, 128], sizes = [8, 128], strides = [1, 1]} : vector<8x512xf32> to vector<8x128xf32>
    %cst_19 = arith.constant 1.000000e+00 : f32
    %50 = vector.broadcast %cst_19 : f32 to vector<8x128xf32>
    %51 = arith.addf %50, %49 : vector<8x128xf32>
    %cst_20 = arith.constant 5.000000e-01 : f32
    %52 = vector.broadcast %cst_20 : f32 to vector<8x128xf32>
    %53 = arith.mulf %52, %51 : vector<8x128xf32>
    %54 = vector.extract_strided_slice %43 {offsets = [0, 256], sizes = [8, 128], strides = [1, 1]} : vector<8x512xf32> to vector<8x128xf32>
    %55 = vector.extract_strided_slice %43 {offsets = [0, 384], sizes = [8, 128], strides = [1, 1]} : vector<8x512xf32> to vector<8x128xf32>
    %cst_21 = arith.constant 1.000000e+00 : f32
    %56 = vector.broadcast %cst_21 : f32 to vector<8x128xf32>
    %57 = arith.addf %56, %55 : vector<8x128xf32>
    %cst_22 = arith.constant 5.000000e-01 : f32
    %58 = vector.broadcast %cst_22 : f32 to vector<8x128xf32>
    %59 = arith.mulf %58, %57 : vector<8x128xf32>
    %60 = arith.mulf %53, %36 : vector<8x128xf32>
    %61 = arith.mulf %48, %54 : vector<8x128xf32>
    %62 = arith.addf %60, %61 : vector<8x128xf32>
    %63 = math.tanh %62 : vector<8x128xf32>
    %64 = arith.mulf %59, %63 : vector<8x128xf32>
    %65 = vector.extract_strided_slice %10 {offsets = [2, 0, 0], sizes = [1, 8, 512], strides = [1, 1, 1]} : vector<8x8x512xf32> to vector<1x8x512xf32>
    %66 = vector.shape_cast %65 : vector<1x8x512xf32> to vector<8x512xf32>
    %cst_23 = arith.constant dense<0.000000e+00> : vector<8x512xf32>
    %67 = tpu.matmul %64, %0, %cst_23 {dimension_numbers = #tpu.dot_dimension_numbers<[1], [0], [0], [1], [0, 0, 1, 1], [], []>} : vector<8x128xf32>, vector<128x512xf32>, vector<8x512xf32> -> vector<8x512xf32>
    %68 = arith.addf %66, %67 : vector<8x512xf32>
    %69 = math.tanh %68 : vector<8x512xf32>
    %70 = vector.extract_strided_slice %69 {offsets = [0, 0], sizes = [8, 128], strides = [1, 1]} : vector<8x512xf32> to vector<8x128xf32>
    %cst_24 = arith.constant 1.000000e+00 : f32
    %71 = vector.broadcast %cst_24 : f32 to vector<8x128xf32>
    %72 = arith.addf %71, %70 : vector<8x128xf32>
    %cst_25 = arith.constant 5.000000e-01 : f32
    %73 = vector.broadcast %cst_25 : f32 to vector<8x128xf32>
    %74 = arith.mulf %73, %72 : vector<8x128xf32>
    %75 = vector.extract_strided_slice %69 {offsets = [0, 128], sizes = [8, 128], strides = [1, 1]} : vector<8x512xf32> to vector<8x128xf32>
    %cst_26 = arith.constant 1.000000e+00 : f32
    %76 = vector.broadcast %cst_26 : f32 to vector<8x128xf32>
    %77 = arith.addf %76, %75 : vector<8x128xf32>
    %cst_27 = arith.constant 5.000000e-01 : f32
    %78 = vector.broadcast %cst_27 : f32 to vector<8x128xf32>
    %79 = arith.mulf %78, %77 : vector<8x128xf32>
    %80 = vector.extract_strided_slice %69 {offsets = [0, 256], sizes = [8, 128], strides = [1, 1]} : vector<8x512xf32> to vector<8x128xf32>
    %81 = vector.extract_strided_slice %69 {offsets = [0, 384], sizes = [8, 128], strides = [1, 1]} : vector<8x512xf32> to vector<8x128xf32>
    %cst_28 = arith.constant 1.000000e+00 : f32
    %82 = vector.broadcast %cst_28 : f32 to vector<8x128xf32>
    %83 = arith.addf %82, %81 : vector<8x128xf32>
    %cst_29 = arith.constant 5.000000e-01 : f32
    %84 = vector.broadcast %cst_29 : f32 to vector<8x128xf32>
    %85 = arith.mulf %84, %83 : vector<8x128xf32>
    %86 = arith.mulf %79, %62 : vector<8x128xf32>
    %87 = arith.mulf %74, %80 : vector<8x128xf32>
    %88 = arith.addf %86, %87 : vector<8x128xf32>
    %89 = math.tanh %88 : vector<8x128xf32>
    %90 = arith.mulf %85, %89 : vector<8x128xf32>
    %91 = vector.extract_strided_slice %10 {offsets = [3, 0, 0], sizes = [1, 8, 512], strides = [1, 1, 1]} : vector<8x8x512xf32> to vector<1x8x512xf32>
    %92 = vector.shape_cast %91 : vector<1x8x512xf32> to vector<8x512xf32>
    %cst_30 = arith.constant dense<0.000000e+00> : vector<8x512xf32>
    %93 = tpu.matmul %90, %0, %cst_30 {dimension_numbers = #tpu.dot_dimension_numbers<[1], [0], [0], [1], [0, 0, 1, 1], [], []>} : vector<8x128xf32>, vector<128x512xf32>, vector<8x512xf32> -> vector<8x512xf32>
    %94 = arith.addf %92, %93 : vector<8x512xf32>
    %95 = math.tanh %94 : vector<8x512xf32>
    %96 = vector.extract_strided_slice %95 {offsets = [0, 0], sizes = [8, 128], strides = [1, 1]} : vector<8x512xf32> to vector<8x128xf32>
    %cst_31 = arith.constant 1.000000e+00 : f32
    %97 = vector.broadcast %cst_31 : f32 to vector<8x128xf32>
    %98 = arith.addf %97, %96 : vector<8x128xf32>
    %cst_32 = arith.constant 5.000000e-01 : f32
    %99 = vector.broadcast %cst_32 : f32 to vector<8x128xf32>
    %100 = arith.mulf %99, %98 : vector<8x128xf32>
    %101 = vector.extract_strided_slice %95 {offsets = [0, 128], sizes = [8, 128], strides = [1, 1]} : vector<8x512xf32> to vector<8x128xf32>
    %cst_33 = arith.constant 1.000000e+00 : f32
    %102 = vector.broadcast %cst_33 : f32 to vector<8x128xf32>
    %103 = arith.addf %102, %101 : vector<8x128xf32>
    %cst_34 = arith.constant 5.000000e-01 : f32
    %104 = vector.broadcast %cst_34 : f32 to vector<8x128xf32>
    %105 = arith.mulf %104, %103 : vector<8x128xf32>
    %106 = vector.extract_strided_slice %95 {offsets = [0, 256], sizes = [8, 128], strides = [1, 1]} : vector<8x512xf32> to vector<8x128xf32>
    %107 = vector.extract_strided_slice %95 {offsets = [0, 384], sizes = [8, 128], strides = [1, 1]} : vector<8x512xf32> to vector<8x128xf32>
    %cst_35 = arith.constant 1.000000e+00 : f32
    %108 = vector.broadcast %cst_35 : f32 to vector<8x128xf32>
    %109 = arith.addf %108, %107 : vector<8x128xf32>
    %cst_36 = arith.constant 5.000000e-01 : f32
    %110 = vector.broadcast %cst_36 : f32 to vector<8x128xf32>
    %111 = arith.mulf %110, %109 : vector<8x128xf32>
    %112 = arith.mulf %105, %88 : vector<8x128xf32>
    %113 = arith.mulf %100, %106 : vector<8x128xf32>
    %114 = arith.addf %112, %113 : vector<8x128xf32>
    %115 = math.tanh %114 : vector<8x128xf32>
    %116 = arith.mulf %111, %115 : vector<8x128xf32>
    %117 = vector.extract_strided_slice %10 {offsets = [4, 0, 0], sizes = [1, 8, 512], strides = [1, 1, 1]} : vector<8x8x512xf32> to vector<1x8x512xf32>
    %118 = vector.shape_cast %117 : vector<1x8x512xf32> to vector<8x512xf32>
    %cst_37 = arith.constant dense<0.000000e+00> : vector<8x512xf32>
    %119 = tpu.matmul %116, %0, %cst_37 {dimension_numbers = #tpu.dot_dimension_numbers<[1], [0], [0], [1], [0, 0, 1, 1], [], []>} : vector<8x128xf32>, vector<128x512xf32>, vector<8x512xf32> -> vector<8x512xf32>
    %120 = arith.addf %118, %119 : vector<8x512xf32>
    %121 = math.tanh %120 : vector<8x512xf32>
    %122 = vector.extract_strided_slice %121 {offsets = [0, 0], sizes = [8, 128], strides = [1, 1]} : vector<8x512xf32> to vector<8x128xf32>
    %cst_38 = arith.constant 1.000000e+00 : f32
    %123 = vector.broadcast %cst_38 : f32 to vector<8x128xf32>
    %124 = arith.addf %123, %122 : vector<8x128xf32>
    %cst_39 = arith.constant 5.000000e-01 : f32
    %125 = vector.broadcast %cst_39 : f32 to vector<8x128xf32>
    %126 = arith.mulf %125, %124 : vector<8x128xf32>
    %127 = vector.extract_strided_slice %121 {offsets = [0, 128], sizes = [8, 128], strides = [1, 1]} : vector<8x512xf32> to vector<8x128xf32>
    %cst_40 = arith.constant 1.000000e+00 : f32
    %128 = vector.broadcast %cst_40 : f32 to vector<8x128xf32>
    %129 = arith.addf %128, %127 : vector<8x128xf32>
    %cst_41 = arith.constant 5.000000e-01 : f32
    %130 = vector.broadcast %cst_41 : f32 to vector<8x128xf32>
    %131 = arith.mulf %130, %129 : vector<8x128xf32>
    %132 = vector.extract_strided_slice %121 {offsets = [0, 256], sizes = [8, 128], strides = [1, 1]} : vector<8x512xf32> to vector<8x128xf32>
    %133 = vector.extract_strided_slice %121 {offsets = [0, 384], sizes = [8, 128], strides = [1, 1]} : vector<8x512xf32> to vector<8x128xf32>
    %cst_42 = arith.constant 1.000000e+00 : f32
    %134 = vector.broadcast %cst_42 : f32 to vector<8x128xf32>
    %135 = arith.addf %134, %133 : vector<8x128xf32>
    %cst_43 = arith.constant 5.000000e-01 : f32
    %136 = vector.broadcast %cst_43 : f32 to vector<8x128xf32>
    %137 = arith.mulf %136, %135 : vector<8x128xf32>
    %138 = arith.mulf %131, %114 : vector<8x128xf32>
    %139 = arith.mulf %126, %132 : vector<8x128xf32>
    %140 = arith.addf %138, %139 : vector<8x128xf32>
    %141 = math.tanh %140 : vector<8x128xf32>
    %142 = arith.mulf %137, %141 : vector<8x128xf32>
    %143 = vector.extract_strided_slice %10 {offsets = [5, 0, 0], sizes = [1, 8, 512], strides = [1, 1, 1]} : vector<8x8x512xf32> to vector<1x8x512xf32>
    %144 = vector.shape_cast %143 : vector<1x8x512xf32> to vector<8x512xf32>
    %cst_44 = arith.constant dense<0.000000e+00> : vector<8x512xf32>
    %145 = tpu.matmul %142, %0, %cst_44 {dimension_numbers = #tpu.dot_dimension_numbers<[1], [0], [0], [1], [0, 0, 1, 1], [], []>} : vector<8x128xf32>, vector<128x512xf32>, vector<8x512xf32> -> vector<8x512xf32>
    %146 = arith.addf %144, %145 : vector<8x512xf32>
    %147 = math.tanh %146 : vector<8x512xf32>
    %148 = vector.extract_strided_slice %147 {offsets = [0, 0], sizes = [8, 128], strides = [1, 1]} : vector<8x512xf32> to vector<8x128xf32>
    %cst_45 = arith.constant 1.000000e+00 : f32
    %149 = vector.broadcast %cst_45 : f32 to vector<8x128xf32>
    %150 = arith.addf %149, %148 : vector<8x128xf32>
    %cst_46 = arith.constant 5.000000e-01 : f32
    %151 = vector.broadcast %cst_46 : f32 to vector<8x128xf32>
    %152 = arith.mulf %151, %150 : vector<8x128xf32>
    %153 = vector.extract_strided_slice %147 {offsets = [0, 128], sizes = [8, 128], strides = [1, 1]} : vector<8x512xf32> to vector<8x128xf32>
    %cst_47 = arith.constant 1.000000e+00 : f32
    %154 = vector.broadcast %cst_47 : f32 to vector<8x128xf32>
    %155 = arith.addf %154, %153 : vector<8x128xf32>
    %cst_48 = arith.constant 5.000000e-01 : f32
    %156 = vector.broadcast %cst_48 : f32 to vector<8x128xf32>
    %157 = arith.mulf %156, %155 : vector<8x128xf32>
    %158 = vector.extract_strided_slice %147 {offsets = [0, 256], sizes = [8, 128], strides = [1, 1]} : vector<8x512xf32> to vector<8x128xf32>
    %159 = vector.extract_strided_slice %147 {offsets = [0, 384], sizes = [8, 128], strides = [1, 1]} : vector<8x512xf32> to vector<8x128xf32>
    %cst_49 = arith.constant 1.000000e+00 : f32
    %160 = vector.broadcast %cst_49 : f32 to vector<8x128xf32>
    %161 = arith.addf %160, %159 : vector<8x128xf32>
    %cst_50 = arith.constant 5.000000e-01 : f32
    %162 = vector.broadcast %cst_50 : f32 to vector<8x128xf32>
    %163 = arith.mulf %162, %161 : vector<8x128xf32>
    %164 = arith.mulf %157, %140 : vector<8x128xf32>
    %165 = arith.mulf %152, %158 : vector<8x128xf32>
    %166 = arith.addf %164, %165 : vector<8x128xf32>
    %167 = math.tanh %166 : vector<8x128xf32>
    %168 = arith.mulf %163, %167 : vector<8x128xf32>
    %169 = vector.extract_strided_slice %10 {offsets = [6, 0, 0], sizes = [1, 8, 512], strides = [1, 1, 1]} : vector<8x8x512xf32> to vector<1x8x512xf32>
    %170 = vector.shape_cast %169 : vector<1x8x512xf32> to vector<8x512xf32>
    %cst_51 = arith.constant dense<0.000000e+00> : vector<8x512xf32>
    %171 = tpu.matmul %168, %0, %cst_51 {dimension_numbers = #tpu.dot_dimension_numbers<[1], [0], [0], [1], [0, 0, 1, 1], [], []>} : vector<8x128xf32>, vector<128x512xf32>, vector<8x512xf32> -> vector<8x512xf32>
    %172 = arith.addf %170, %171 : vector<8x512xf32>
    %173 = math.tanh %172 : vector<8x512xf32>
    %174 = vector.extract_strided_slice %173 {offsets = [0, 0], sizes = [8, 128], strides = [1, 1]} : vector<8x512xf32> to vector<8x128xf32>
    %cst_52 = arith.constant 1.000000e+00 : f32
    %175 = vector.broadcast %cst_52 : f32 to vector<8x128xf32>
    %176 = arith.addf %175, %174 : vector<8x128xf32>
    %cst_53 = arith.constant 5.000000e-01 : f32
    %177 = vector.broadcast %cst_53 : f32 to vector<8x128xf32>
    %178 = arith.mulf %177, %176 : vector<8x128xf32>
    %179 = vector.extract_strided_slice %173 {offsets = [0, 128], sizes = [8, 128], strides = [1, 1]} : vector<8x512xf32> to vector<8x128xf32>
    %cst_54 = arith.constant 1.000000e+00 : f32
    %180 = vector.broadcast %cst_54 : f32 to vector<8x128xf32>
    %181 = arith.addf %180, %179 : vector<8x128xf32>
    %cst_55 = arith.constant 5.000000e-01 : f32
    %182 = vector.broadcast %cst_55 : f32 to vector<8x128xf32>
    %183 = arith.mulf %182, %181 : vector<8x128xf32>
    %184 = vector.extract_strided_slice %173 {offsets = [0, 256], sizes = [8, 128], strides = [1, 1]} : vector<8x512xf32> to vector<8x128xf32>
    %185 = vector.extract_strided_slice %173 {offsets = [0, 384], sizes = [8, 128], strides = [1, 1]} : vector<8x512xf32> to vector<8x128xf32>
    %cst_56 = arith.constant 1.000000e+00 : f32
    %186 = vector.broadcast %cst_56 : f32 to vector<8x128xf32>
    %187 = arith.addf %186, %185 : vector<8x128xf32>
    %cst_57 = arith.constant 5.000000e-01 : f32
    %188 = vector.broadcast %cst_57 : f32 to vector<8x128xf32>
    %189 = arith.mulf %188, %187 : vector<8x128xf32>
    %190 = arith.mulf %183, %166 : vector<8x128xf32>
    %191 = arith.mulf %178, %184 : vector<8x128xf32>
    %192 = arith.addf %190, %191 : vector<8x128xf32>
    %193 = math.tanh %192 : vector<8x128xf32>
    %194 = arith.mulf %189, %193 : vector<8x128xf32>
    %195 = vector.extract_strided_slice %10 {offsets = [7, 0, 0], sizes = [1, 8, 512], strides = [1, 1, 1]} : vector<8x8x512xf32> to vector<1x8x512xf32>
    %196 = vector.shape_cast %195 : vector<1x8x512xf32> to vector<8x512xf32>
    %cst_58 = arith.constant dense<0.000000e+00> : vector<8x512xf32>
    %197 = tpu.matmul %194, %0, %cst_58 {dimension_numbers = #tpu.dot_dimension_numbers<[1], [0], [0], [1], [0, 0, 1, 1], [], []>} : vector<8x128xf32>, vector<128x512xf32>, vector<8x512xf32> -> vector<8x512xf32>
    %198 = arith.addf %196, %197 : vector<8x512xf32>
    %199 = math.tanh %198 : vector<8x512xf32>
    %200 = vector.extract_strided_slice %199 {offsets = [0, 0], sizes = [8, 128], strides = [1, 1]} : vector<8x512xf32> to vector<8x128xf32>
    %cst_59 = arith.constant 1.000000e+00 : f32
    %201 = vector.broadcast %cst_59 : f32 to vector<8x128xf32>
    %202 = arith.addf %201, %200 : vector<8x128xf32>
    %cst_60 = arith.constant 5.000000e-01 : f32
    %203 = vector.broadcast %cst_60 : f32 to vector<8x128xf32>
    %204 = arith.mulf %203, %202 : vector<8x128xf32>
    %205 = vector.extract_strided_slice %199 {offsets = [0, 128], sizes = [8, 128], strides = [1, 1]} : vector<8x512xf32> to vector<8x128xf32>
    %cst_61 = arith.constant 1.000000e+00 : f32
    %206 = vector.broadcast %cst_61 : f32 to vector<8x128xf32>
    %207 = arith.addf %206, %205 : vector<8x128xf32>
    %cst_62 = arith.constant 5.000000e-01 : f32
    %208 = vector.broadcast %cst_62 : f32 to vector<8x128xf32>
    %209 = arith.mulf %208, %207 : vector<8x128xf32>
    %210 = vector.extract_strided_slice %199 {offsets = [0, 256], sizes = [8, 128], strides = [1, 1]} : vector<8x512xf32> to vector<8x128xf32>
    %211 = vector.extract_strided_slice %199 {offsets = [0, 384], sizes = [8, 128], strides = [1, 1]} : vector<8x512xf32> to vector<8x128xf32>
    %cst_63 = arith.constant 1.000000e+00 : f32
    %212 = vector.broadcast %cst_63 : f32 to vector<8x128xf32>
    %213 = arith.addf %212, %211 : vector<8x128xf32>
    %cst_64 = arith.constant 5.000000e-01 : f32
    %214 = vector.broadcast %cst_64 : f32 to vector<8x128xf32>
    %215 = arith.mulf %214, %213 : vector<8x128xf32>
    %216 = arith.mulf %209, %192 : vector<8x128xf32>
    %217 = arith.mulf %204, %210 : vector<8x128xf32>
    %218 = arith.addf %216, %217 : vector<8x128xf32>
    %219 = math.tanh %218 : vector<8x128xf32>
    %220 = arith.mulf %215, %219 : vector<8x128xf32>
    %c0_65 = arith.constant 0 : index
    %c0_66 = arith.constant 0 : index
    %221 = vector.load %arg4[%c0_65, %c0_66] : memref<128x128xf32, #tpu.memory_space<vmem>>, vector<128x128xf32>
    %cst_67 = arith.constant dense<0.000000e+00> : vector<8x128xf32>
    %222 = tpu.matmul %220, %221, %cst_67 {dimension_numbers = #tpu.dot_dimension_numbers<[1], [0], [0], [1], [0, 0, 1, 1], [], []>} : vector<8x128xf32>, vector<128x128xf32>, vector<8x128xf32> -> vector<8x128xf32>
    %c0_68 = arith.constant 0 : index
    %c0_69 = arith.constant 0 : index
    %223 = vector.load %arg5[%c0_68, %c0_69] : memref<1x128xf32, #tpu.memory_space<vmem>>, vector<1x128xf32>
    %224 = vector.broadcast %223 : vector<1x128xf32> to vector<8x128xf32>
    %225 = arith.addf %222, %224 : vector<8x128xf32>
    %cst_70 = arith.constant dense<0xFF800000> : vector<8xf32>
    %226 = vector.multi_reduction <maximumf>, %225, %cst_70 [1] : vector<8x128xf32> to vector<8xf32>
    %227 = vector.shape_cast %226 : vector<8xf32> to vector<8x1xf32>
    %228 = vector.broadcast %227 : vector<8x1xf32> to vector<8x128xf32>
    %229 = arith.subf %225, %228 : vector<8x128xf32>
    %230 = math.exp %229 : vector<8x128xf32>
    %cst_71 = arith.constant dense<0.000000e+00> : vector<8xf32>
    %231 = vector.multi_reduction <add>, %230, %cst_71 [1] : vector<8x128xf32> to vector<8xf32>
    %232 = vector.shape_cast %231 : vector<8xf32> to vector<8x1xf32>
    %233 = math.log %232 : vector<8x1xf32>
    %234 = vector.broadcast %233 : vector<8x1xf32> to vector<8x128xf32>
    %235 = arith.subf %229, %234 : vector<8x128xf32>
    %c0_72 = arith.constant 0 : index
    %c0_73 = arith.constant 0 : index
    %236 = vector.load %arg6[%c0_72, %c0_73] : memref<8x128xf32, #tpu.memory_space<vmem>>, vector<8x128xf32>
    tpu.vector_store %arg6[%c0_72, %c0_73], %235 {strides = array<i32>} : memref<8x128xf32, #tpu.memory_space<vmem>>, vector<8x128xf32>,
    return
  }
}

</mosaic_0001>

<bundles_post_ra>
// kernel: tpu_custom_call.1
= control target key start
LH: loop header
LB: loop body
LE: loop exit
PB: predicated region body
PF: predicated region fallthrough
CT: control target
= control target key end

     0   :  { %11 = vsyncpa [#allocation3], 0  ;;  %s2957_s0 = inlined_call_operand.vmem [shape: f32[8,8,1], index: 0, kind: input, shape index: {}]   ;;  %s2958_s1 = inlined_call_operand.vmem [shape: f32[1,512], index: 1, kind: input, shape index: {}]   ;;  %s2959_s2 = inlined_call_operand.hbm [shape: f32[128,512], index: 2, kind: input, shape index: {}]   ;;  %s2960_s3 = inlined_call_operand.vmem [shape: f32[1,512], index: 3, kind: input, shape index: {}]   ;;  %s2961_s4 = inlined_call_operand.hbm [shape: f32[128,128], index: 4, kind: input, shape index: {}]   ;;  %s2962_s5 = inlined_call_operand.vmem [shape: f32[1,128], index: 5, kind: input, shape index: {}]   ;;  %s2963_s6 = inlined_call_operand.hbm [shape: f32[8,128], index: 6, kind: output, shape index: {}]  }
   0x1   :  { %12 = vsyncpa [#allocation6], 0 }
   0x2   :  { %13 = vsyncpa [#allocation4], 0  ;;  %s1959_s21 = smov [#allocation2]  }
   0x3   :  { %s23_s22 = sshll.u32 %s1959_s21, 4  ;;  %s24_s22 = int_to_ptr.vmem [resolvable:$true] %s23_s22 }
   0x4   :  { %s1901_s23 = scalar_lea.vmem %s24_s22, 8192  ;;  %p1906_p1 = scmp.lt.s32.totalorder %s24_s22, %s24_s22 }
   0x5   :  { %p1902_p0 = scmp.ne.s32.totalorder %s24_s22, %s1901_s23  ;;  %p1907_p2 = scmp.lt.s32.totalorder %s1901_s23, %s1901_s23 }
   0x7   :  { %p1908_p3 = por %p1907_p2, %p1906_p1 }
   0x9   :  { %p1909_p4 = pnand %p1908_p3, %p1902_p0 }
   0xb   :  { %1912 = shalt.err (!%p1909_p4)
}
   0xc   :  { %s1960_s24 = smov 512   ;;  %s1961_s25 = smov 32  }
   0xd   :  { %29 = dma.hbm_to_vmem [thread:$0]  %s2959_s2, 8192, %s24_s22, [#allocation3], %s1960_s24, %s1960_s24, %s1961_s25  }
   0xe   :  { %s1962_s28 = smov [#allocation5]  }
   0xf   :  { %s37_s29 = sshll.u32 %s1962_s28, 4  ;;  %s38_s29 = int_to_ptr.vmem [resolvable:$true] %s37_s29 }
  0x10   :  { %s1921_s30 = scalar_lea.vmem %s38_s29, 2048  ;;  %p1926_p6 = scmp.lt.s32.totalorder %s38_s29, %s38_s29 }
  0x11   :  { %p1922_p5 = scmp.ne.s32.totalorder %s38_s29, %s1921_s30  ;;  %p1927_p7 = scmp.lt.s32.totalorder %s1921_s30, %s1921_s30 }
  0x13   :  { %p1928_p8 = por %p1927_p7, %p1926_p6 }
  0x15   :  { %p1929_p9 = pnand %p1928_p8, %p1922_p5 }
  0x17   :  { %1932 = shalt.err (!%p1929_p9)
}
  0x18   :  { %s1963_s7 = smov 128   ;;  %s1964_s8 = smov 8  }
  0x19   :  { %43 = dma.hbm_to_vmem [thread:$0]  %s2961_s4, 2048, %s38_s29, [#allocation6], %s1963_s7, %s1963_s7, %s1964_s8  }
  0x1a   :  { %1953 = dma.done.wait [#allocation3], 8192  }
  0x1b   :  { %1954 = vsyncadd [#allocation3], 4294959104 }
  0x1c   :  { %1955 = dma.done.wait [#allocation6], 2048  }
  0x1d   :  { %1956 = vsyncadd [#allocation6], 4294965248  ;;  %v2964_v0 = vmov 0.0   ;;  %v1966_v1 = vmov 0   ;;  %v2012_v2 = vld [vmem:[#allocation2 + $0x1e8] sm:$0xff]  ;;  %v2014_v3 = vld [vmem:[#allocation2 + $0x1f8] sm:$0xff] }
  0x1e   :  { %336 = vmatprep.mubr.f32.mxu0 %v2964_v0  ;;  %407 = vmatprep.mubr.f32.mxu1 %v2964_v0  ;;  %3078 = vst [vmem:[#allocation11_spill] sm:$0xff] %v2012_v2  ;;  %3079 = vst [vmem:[#allocation12_spill] sm:$0xff] %v2014_v3  ;;  %v2016_v4 = vld [vmem:[#allocation2 + $0x1e0] sm:$0xff]  ;;  %v2020_v5 = vld [vmem:[#allocation2 + $0x1f0] sm:$0xff]  ;;  %vm1967_vm0 = vmmov 0   ;;  %s1968_s28 = smov [#allocation7]  }
  0x1f   :  { %1743 = vset.pattern.permute.xlu0 %v1966_v1  ;;  %1744 = vset.pattern.permute.xlu1 %v1966_v1  ;;  %v2022_v6 = vld [vmem:[#allocation2 + $0x1c8] sm:$0xff]  ;;  %v2024_v7 = vld [vmem:[#allocation2 + $0x1d8] sm:$0xff]  ;;  %v2028_v8 = vld [vmem:[#allocation2 + $0x1c0] sm:$0xff]  ;;  %s1670_s29 = sshll.u32 %s1968_s28, 4  ;;  %s1671_s29 = int_to_ptr.vmem [resolvable:$true] %s1670_s29 }
  0x20   :  { %272 = vmatprep.subr.mxu0 %v2012_v2  ;;  %343 = vmatprep.subr.mxu1 %v2014_v3  ;;  %v2030_v9 = vld [vmem:[#allocation2 + $0x1d0] sm:$0xff]  ;;  %v2032_v10 = vld [vmem:[#allocation2 + $0x1a8] sm:$0xff]  ;;  %v2036_v11 = vld [vmem:[#allocation2 + $0x1b8] sm:$0xff]  ;;  %p1938_p11 = scmp.lt.s32.totalorder %s1671_s29, %s1671_s29 }
  0x21   :  { %273 = vmatpush1.msra.mxu0 %v2016_v4  ;;  %344 = vmatpush1.msra.mxu1 %v2020_v5  ;;  %v2038_v12 = vld [vmem:[#allocation2 + $0x1a0] sm:$0xff]  ;;  %v2040_v13 = vld [vmem:[#allocation2 + $0x1b0] sm:$0xff]  ;;  %v2044_v14 = vld [vmem:[#allocation2 + $0x188] sm:$0xff] }
  0x22   :  { %274 = vmatprep.subr.mxu0 %v2022_v6  ;;  %345 = vmatprep.subr.mxu1 %v2024_v7  ;;  %v2046_v15 = vld [vmem:[#allocation2 + $0x198] sm:$0xff]  ;;  %v2050_v16 = vld [vmem:[#allocation2 + $0x180] sm:$0xff]  ;;  %v2052_v17 = vld [vmem:[#allocation2 + $0x190] sm:$0xff] }
  0x23   :  { %275 = vmatpush1.msra.mxu0 %v2028_v8  ;;  %346 = vmatpush1.msra.mxu1 %v2030_v9  ;;  %v2056_v18 = vld [vmem:[#allocation2 + $0x168] sm:$0xff]  ;;  %v2058_v19 = vld [vmem:[#allocation2 + $0x178] sm:$0xff]  ;;  %v2062_v20 = vld [vmem:[#allocation2 + $0x160] sm:$0xff] }
  0x24   :  { %276 = vmatprep.subr.mxu0 %v2032_v10  ;;  %347 = vmatprep.subr.mxu1 %v2036_v11  ;;  %v2064_v21 = vld [vmem:[#allocation2 + $0x170] sm:$0xff]  ;;  %v2068_v22 = vld [vmem:[#allocation2 + $0x148] sm:$0xff]  ;;  %v2070_v23 = vld [vmem:[#allocation2 + $0x158] sm:$0xff] }
  0x25   :  { %277 = vmatpush1.msra.mxu0 %v2038_v12  ;;  %348 = vmatpush1.msra.mxu1 %v2040_v13  ;;  %v2074_v24 = vld [vmem:[#allocation2 + $0x140] sm:$0xff]  ;;  %v2076_v25 = vld [vmem:[#allocation2 + $0x150] sm:$0xff]  ;;  %v2080_v26 = vld [vmem:[#allocation2 + $0x128] sm:$0xff] }
  0x26   :  { %278 = vmatprep.subr.mxu0 %v2044_v14  ;;  %349 = vmatprep.subr.mxu1 %v2046_v15  ;;  %v2082_v27 = vld [vmem:[#allocation2 + $0x138] sm:$0xff]  ;;  %v2086_v28 = vld [vmem:[#allocation2 + $0x120] sm:$0xff]  ;;  %v2088_v29 = vld [vmem:[#allocation2 + $0x130] sm:$0xff] }
  0x27   :  { %279 = vmatpush1.msra.mxu0 %v2050_v16  ;;  %350 = vmatpush1.msra.mxu1 %v2052_v17  ;;  %v2092_v30 = vld [vmem:[#allocation2 + $0x108] sm:$0xff]  ;;  %v2094_v31 = vld [vmem:[#allocation2 + $0x118] sm:$0xff]  ;;  %v2098_v32 = vld [vmem:[#allocation2 + $0x100] sm:$0xff] }
  0x28   :  { %280 = vmatprep.subr.mxu0 %v2056_v18  ;;  %351 = vmatprep.subr.mxu1 %v2058_v19  ;;  %v2100_v33 = vld [vmem:[#allocation2 + $0x110] sm:$0xff]  ;;  %v2104_v34 = vld [vmem:[#allocation2 + $0xe8] sm:$0xff]  ;;  %v2106_v35 = vld [vmem:[#allocation2 + $0xf8] sm:$0xff] }
  0x29   :  { %281 = vmatpush1.msra.mxu0 %v2062_v20  ;;  %352 = vmatpush1.msra.mxu1 %v2064_v21  ;;  %v2110_v36 = vld [vmem:[#allocation2 + $0xe0] sm:$0xff]  ;;  %v2112_v37 = vld [vmem:[#allocation2 + $0xf0] sm:$0xff]  ;;  %v2116_v38 = vld [vmem:[#allocation2 + $0xc8] sm:$0xff] }
  0x2a   :  { %282 = vmatprep.subr.mxu0 %v2068_v22  ;;  %353 = vmatprep.subr.mxu1 %v2070_v23  ;;  %v2118_v39 = vld [vmem:[#allocation2 + $0xd8] sm:$0xff]  ;;  %v2122_v40 = vld [vmem:[#allocation2 + $0xc0] sm:$0xff]  ;;  %v2124_v41 = vld [vmem:[#allocation2 + $0xd0] sm:$0xff] }
  0x2b   :  { %283 = vmatpush1.msra.mxu0 %v2074_v24  ;;  %354 = vmatpush1.msra.mxu1 %v2076_v25  ;;  %v2128_v42 = vld [vmem:[#allocation2 + $0xa8] sm:$0xff]  ;;  %v2130_v43 = vld [vmem:[#allocation2 + $0xb8] sm:$0xff]  ;;  %v2134_v44 = vld [vmem:[#allocation2 + $0xa0] sm:$0xff] }
  0x2c   :  { %284 = vmatprep.subr.mxu0 %v2080_v26  ;;  %355 = vmatprep.subr.mxu1 %v2082_v27  ;;  %v2136_v45 = vld [vmem:[#allocation2 + $0xb0] sm:$0xff]  ;;  %v2140_v46 = vld [vmem:[#allocation2 + $0x88] sm:$0xff]  ;;  %v2142_v47 = vld [vmem:[#allocation2 + $0x98] sm:$0xff] }
  0x2d   :  { %285 = vmatpush1.msra.mxu0 %v2086_v28  ;;  %356 = vmatpush1.msra.mxu1 %v2088_v29  ;;  %3080 = vst [vmem:[#allocation13_spill] sm:$0xff] %v2136_v45  ;;  %3081 = vst [vmem:[#allocation14_spill] sm:$0xff] %v2140_v46  ;;  %v2146_v48 = vld [vmem:[#allocation2 + $0x80] sm:$0xff]  ;;  %v2148_v49 = vld [vmem:[#allocation2 + $0x90] sm:$0xff] }
  0x2e   :  { %286 = vmatprep.subr.mxu0 %v2092_v30  ;;  %357 = vmatprep.subr.mxu1 %v2094_v31  ;;  %3082 = vst [vmem:[#allocation15_spill] sm:$0xff] %v2142_v47  ;;  %3083 = vst [vmem:[#allocation16_spill] sm:$0xff] %v2146_v48  ;;  %v2152_v50 = vld [vmem:[#allocation2 + $0x68] sm:$0xff]  ;;  %v2154_v51 = vld [vmem:[#allocation2 + $0x78] sm:$0xff] }
  0x2f   :  { %287 = vmatpush1.msra.mxu0 %v2098_v32  ;;  %358 = vmatpush1.msra.mxu1 %v2100_v33  ;;  %3084 = vst [vmem:[#allocation17_spill] sm:$0xff] %v2148_v49  ;;  %3085 = vst [vmem:[#allocation18_spill] sm:$0xff] %v2152_v50  ;;  %v2158_v52 = vld [vmem:[#allocation2 + $0x60] sm:$0xff]  ;;  %v2160_v53 = vld [vmem:[#allocation2 + $0x70] sm:$0xff] }
  0x30   :  { %288 = vmatprep.subr.mxu0 %v2104_v34  ;;  %359 = vmatprep.subr.mxu1 %v2106_v35  ;;  %3086 = vst [vmem:[#allocation19_spill] sm:$0xff] %v2154_v51  ;;  %3087 = vst [vmem:[#allocation20_spill] sm:$0xff] %v2158_v52  ;;  %v2164_v54 = vld [vmem:[#allocation2 + $0x48] sm:$0xff]  ;;  %v2166_v55 = vld [vmem:[#allocation2 + $0x58] sm:$0xff] }
  0x31   :  { %289 = vmatpush1.msra.mxu0 %v2110_v36  ;;  %360 = vmatpush1.msra.mxu1 %v2112_v37  ;;  %3088 = vst [vmem:[#allocation21_spill] sm:$0xff] %v2160_v53  ;;  %3089 = vst [vmem:[#allocation22_spill] sm:$0xff] %v2164_v54  ;;  %v2170_v56 = vld [vmem:[#allocation2 + $0x40] sm:$0xff]  ;;  %v2172_v57 = vld [vmem:[#allocation2 + $0x50] sm:$0xff] }
  0x32   :  { %290 = vmatprep.subr.mxu0 %v2116_v38  ;;  %361 = vmatprep.subr.mxu1 %v2118_v39  ;;  %3090 = vst [vmem:[#allocation23_spill] sm:$0xff] %v2166_v55  ;;  %3091 = vst [vmem:[#allocation24_spill] sm:$0xff] %v2170_v56  ;;  %v2176_v58 = vld [vmem:[#allocation2 + $0x28] sm:$0xff]  ;;  %v2178_v59 = vld [vmem:[#allocation2 + $0x38] sm:$0xff] }
  0x33   :  { %291 = vmatpush1.msra.mxu0 %v2122_v40  ;;  %362 = vmatpush1.msra.mxu1 %v2124_v41  ;;  %3092 = vst [vmem:[#allocation25_spill] sm:$0xff] %v2172_v57  ;;  %3093 = vst [vmem:[#allocation26_spill] sm:$0xff] %v2176_v58  ;;  %v2182_v60 = vld [vmem:[#allocation2 + $0x20] sm:$0xff]  ;;  %v2184_v61 = vld [vmem:[#allocation2 + $0x30] sm:$0xff] }
  0x34   :  { %292 = vmatprep.subr.mxu0 %v2128_v42  ;;  %363 = vmatprep.subr.mxu1 %v2130_v43  ;;  %3094 = vst [vmem:[#allocation27_spill] sm:$0xff] %v2178_v59  ;;  %3095 = vst [vmem:[#allocation28_spill] sm:$0xff] %v2182_v60  ;;  %v2188_v62 = vld [vmem:[#allocation2 + $0x8] sm:$0xff]  ;;  %v2190_v63 = vld [vmem:[#allocation2 + $0x18] sm:$0xff] }
  0x35   :  { %293 = vmatpush1.msra.mxu0 %v2134_v44  ;;  %364 = vmatpush1.msra.mxu1 %v2136_v45  ;;  %3096 = vst [vmem:[#allocation29_spill] sm:$0xff] %v2184_v61  ;;  %3097 = vst [vmem:[#allocation30_spill] sm:$0xff] %v2188_v62  ;;  %v2194_v1 = vld [vmem:[#allocation2] sm:$0xff]  ;;  %v2196_v0 = vld [vmem:[#allocation2 + $0x10] sm:$0xff] }
  0x36   :  { %294 = vmatprep.subr.mxu0 %v2140_v46  ;;  %365 = vmatprep.subr.mxu1 %v2142_v47  ;;  %3098 = vst [vmem:[#allocation31_spill] sm:$0xff] %v2190_v63  ;;  %3099 = vst [vmem:[#allocation32_spill] sm:$0xff] %v2194_v1 }
  0x37   :  { %295 = vmatpush1.msra.mxu0 %v2146_v48  ;;  %366 = vmatpush1.msra.mxu1 %v2148_v49  ;;  %3100 = vst [vmem:[#allocation33_spill] sm:$0xff] %v2196_v0 }
  0x38   :  { %296 = vmatprep.subr.mxu0 %v2152_v50  ;;  %367 = vmatprep.subr.mxu1 %v2154_v51 }
  0x39   :  { %297 = vmatpush1.msra.mxu0 %v2158_v52  ;;  %368 = vmatpush1.msra.mxu1 %v2160_v53 }
  0x3a   :  { %298 = vmatprep.subr.mxu0 %v2164_v54  ;;  %369 = vmatprep.subr.mxu1 %v2166_v55 }
  0x3b   :  { %299 = vmatpush1.msra.mxu0 %v2170_v56  ;;  %370 = vmatpush1.msra.mxu1 %v2172_v57  ;;  %v116_v57 = vld [vmem:[%s2957_s0] sm:$0xff] }
  0x3c   :  { %300 = vmatprep.subr.mxu0 %v2176_v58  ;;  %371 = vmatprep.subr.mxu1 %v2178_v59  ;;  %v3101_v59 = vmov 0.0  }
  0x3d   :  { %301 = vmatpush1.msra.mxu0 %v2182_v60  ;;  %372 = vmatpush1.msra.mxu1 %v2184_v61 }
  0x3e   :  { %302 = vmatprep.subr.mxu0 %v2188_v62  ;;  %373 = vmatprep.subr.mxu1 %v2190_v63  ;;  %v117_v62 = vld [vmem:[%s2957_s0 + $0x8] sm:$0xff] }
  0x3f   :  { %303 = vmatpush1.msra.mxu0 %v2194_v1  ;;  %374 = vmatpush1.msra.mxu1 %v2196_v0 }
  0x40   :  { %337 = vmatmul.mubr.f32.vlgmr.msra.gmra.mxu0 %v3101_v59  ;;  %408 = vmatmul.mubr.f32.vlgmr.msra.gmra.mxu1 %v3101_v59 }
  0x41   :  { %127 = vperm.xlu0 %1743, %v116_v57   ;;  %433 = vmatprep.subr.mxu0 %v2012_v2  ;;  %v120_v57 = vld [vmem:[%s2957_s0 + $0x20] sm:$0xff] }
  0x42   :  { %504 = vmatprep.subr.mxu1 %v2014_v3  ;;  %434 = vmatpush1.msra.mxu0 %v2016_v4 }
  0x43   :  { %505 = vmatpush1.msra.mxu1 %v2020_v5  ;;  %435 = vmatprep.subr.mxu0 %v2022_v6 }
  0x44   :  { %506 = vmatprep.subr.mxu1 %v2024_v7  ;;  %436 = vmatpush1.msra.mxu0 %v2028_v8 }
  0x45   :  { %132 = vperm.xlu0 %1743, %v117_v62   ;;  %507 = vmatpush1.msra.mxu1 %v2030_v9  ;;  %v122_v62 = vld [vmem:[%s2957_s0 + $0x30] sm:$0xff] }
  0x46   :  { %437 = vmatprep.subr.mxu0 %v2032_v10  ;;  %508 = vmatprep.subr.mxu1 %v2036_v11 }
  0x47   :  { %438 = vmatpush1.msra.mxu0 %v2038_v12  ;;  %509 = vmatpush1.msra.mxu1 %v2040_v13 }
  0x48   :  { %439 = vmatprep.subr.mxu0 %v2044_v14  ;;  %510 = vmatprep.subr.mxu1 %v2046_v15 }
  0x49   :  { %147 = vperm.xlu0 %1743, %v120_v57   ;;  %440 = vmatpush1.msra.mxu0 %v2050_v16  ;;  %v3102_v57 = vld [vmem:[#allocation25_spill] sm:$0xff] }
  0x4a   :  { %511 = vmatpush1.msra.mxu1 %v2052_v17  ;;  %441 = vmatprep.subr.mxu0 %v2056_v18 }
  0x4b   :  { %512 = vmatprep.subr.mxu1 %v2058_v19  ;;  %442 = vmatpush1.msra.mxu0 %v2062_v20 }
  0x4c   :  { %513 = vmatpush1.msra.mxu1 %v2064_v21  ;;  %443 = vmatprep.subr.mxu0 %v2068_v22 }
  0x4d   :  { %157 = vperm.xlu0 %1743, %v122_v62   ;;  %514 = vmatprep.subr.mxu1 %v2070_v23  ;;  %v3103_v62 = vld [vmem:[#allocation27_spill] sm:$0xff] }
  0x4e   :  { %444 = vmatpush1.msra.mxu0 %v2074_v24  ;;  %515 = vmatpush1.msra.mxu1 %v2076_v25 }
  0x4f   :  { %445 = vmatprep.subr.mxu0 %v2080_v26  ;;  %516 = vmatprep.subr.mxu1 %v2082_v27 }
  0x50   :  { %446 = vmatpush1.msra.mxu0 %v2086_v28  ;;  %517 = vmatpush1.msra.mxu1 %v2088_v29 }
  0x51   :  { %447 = vmatprep.subr.mxu0 %v2092_v30  ;;  %518 = vmatprep.subr.mxu1 %v2094_v31 }
  0x52   :  { %448 = vmatpush1.msra.mxu0 %v2098_v32  ;;  %519 = vmatpush1.msra.mxu1 %v2100_v33 }
  0x53   :  { %449 = vmatprep.subr.mxu0 %v2104_v34  ;;  %520 = vmatprep.subr.mxu1 %v2106_v35 }
  0x54   :  { %450 = vmatpush1.msra.mxu0 %v2110_v36  ;;  %521 = vmatpush1.msra.mxu1 %v2112_v37 }
  0x55   :  { %451 = vmatprep.subr.mxu0 %v2116_v38  ;;  %522 = vmatprep.subr.mxu1 %v2118_v39 }
  0x56   :  { %452 = vmatpush1.msra.mxu0 %v2122_v40  ;;  %523 = vmatpush1.msra.mxu1 %v2124_v41 }
  0x57   :  { %453 = vmatprep.subr.mxu0 %v2128_v42  ;;  %524 = vmatprep.subr.mxu1 %v2130_v43 }
  0x58   :  { %454 = vmatpush1.msra.mxu0 %v2134_v44  ;;  %525 = vmatpush1.msra.mxu1 %v2136_v45 }
  0x59   :  { %455 = vmatprep.subr.mxu0 %v2140_v46  ;;  %526 = vmatprep.subr.mxu1 %v2142_v47 }
  0x5a   :  { %456 = vmatpush1.msra.mxu0 %v2146_v48  ;;  %527 = vmatpush1.msra.mxu1 %v2148_v49 }
  0x5b   :  { %457 = vmatprep.subr.mxu0 %v2152_v50  ;;  %528 = vmatprep.subr.mxu1 %v2154_v51  ;;  %v3104_v51 = vld [vmem:[#allocation30_spill] sm:$0xff] }
  0x5c   :  { %458 = vmatpush1.msra.mxu0 %v2158_v52  ;;  %529 = vmatpush1.msra.mxu1 %v2160_v53 }
  0x5d   :  { %459 = vmatprep.subr.mxu0 %v2164_v54  ;;  %530 = vmatprep.subr.mxu1 %v2166_v55 }
  0x5e   :  { %460 = vmatpush1.msra.mxu0 %v2170_v56  ;;  %531 = vmatpush1.msra.mxu1 %v3102_v57 }
  0x5f   :  { %461 = vmatprep.subr.mxu0 %v2176_v58  ;;  %532 = vmatprep.subr.mxu1 %v3103_v62  ;;  %v166_v62 = vlaneseq }
  0x60   :  { %462 = vmatpush1.msra.mxu0 %v2182_v60  ;;  %533 = vmatpush1.msra.mxu1 %v2184_v61 }
  0x61   :  { %463 = vmatprep.subr.mxu0 %v3104_v51  ;;  %534 = vmatprep.subr.mxu1 %v2190_v63  ;;  %v167_v60 = vshrl.u32 %v166_v62, 7  ;;  %v124_v51 = vld [vmem:[%s2958_s1] sm:$0xf] }
  0x62   :  { %464 = vmatpush1.msra.mxu0 %v2194_v1  ;;  %497 = vmatprep.mubr.f32.mxu0 %v3101_v59 }
  0x63   :  { %535 = vmatpush1.msra.mxu1 %v2196_v0  ;;  %568 = vmatprep.mubr.f32.mxu1 %v3101_v59  ;;  %v168_v58 = vsub.s32 0, %v167_v60  ;;  %v172_v63 = vsub.s32 1, %v167_v60  ;;  %v176_v1 = vsub.s32 2, %v167_v60  ;;  %v218_v0 = vld [vmem:[%s2960_s3] sm:$0xf]  ;;  %v180_v49 = vsub.s32 3, %v167_v60 }
  0x64   :  { %594 = vmatprep.subr.mxu0 %v2012_v2  ;;  %665 = vmatprep.subr.mxu1 %v2014_v3 }
  0x65   :  { %v2289_v61 = vrot.slane %v124_v51, %v168_v58  ;;  %v2294_v59 = vrot.slane %v124_v51, %v172_v63  ;;  %v2297_v57 = vrot.slane %v218_v0, %v168_v58  ;;  %v2299_v62 = vrot.slane %v124_v51, %v176_v1 }
  0x66   :  { %v2302_v55 = vrot.slane %v218_v0, %v172_v63  ;;  %v2306_v52 = vrot.slane %v218_v0, %v176_v1  ;;  %v2310_v45 = vrot.slane %v124_v51, %v180_v49 }
  0x67   :  { %3105 = vst [vmem:[#allocation34_spill] sm:$0xff] %v2289_v61  ;;  %3106 = vst [vmem:[#allocation35_spill] sm:$0xff] %v2294_v59 }
  0x68   :  { %3107 = vst [vmem:[#allocation36_spill] sm:$0xff] %v2297_v57  ;;  %3108 = vst [vmem:[#allocation37_spill] sm:$0xff] %v2299_v62 }
  0x69   :  { %3109 = vst [vmem:[#allocation38_spill] sm:$0xff] %v2302_v55  ;;  %3110 = vst [vmem:[#allocation39_spill] sm:$0xff] %v2306_v52 }
  0xbc   :  { %v128_v2 = vpop.permute.xlu0 %127 }
  0xbd   :  { %v186_v3 = vmul.f32 %v2289_v61, %v128_v2  ;;  %v187_v56 = vmul.f32 %v2294_v59, %v128_v2  ;;  %v188_v53 = vmul.f32 %v2299_v62, %v128_v2  ;;  %v2313_v62 = vrot.slane %v218_v0, %v180_v49 }
  0xbf   :  { %v240_v54 = vadd.f32 %v2297_v57, %v186_v3  ;;  %v241_v50 = vadd.f32 %v2302_v55, %v187_v56  ;;  %v242_v58 = vadd.f32 %v2306_v52, %v188_v53  ;;  %v189_v3 = vmul.f32 %v2310_v45, %v128_v2 }
  0xc1   :  { %v243_v56 = vadd.f32 %v2313_v62, %v189_v3  ;;  %v3112_v3 = vld [vmem:[#allocation14_spill] sm:$0xff] }
 0x100   :  { %v338_v48 = vpop.f32.mrf.mxu0  ;;  %v409_v63 = vpop.f32.mrf.mxu1 }
 0x101   :  { %v414_v47 = vadd.f32 %v338_v48, %v240_v54  ;;  %v416_v59 = vadd.f32 %v409_v63, %v242_v58 }
 0x102   :  { %v340_v61 = vpop.f32.mrf.mxu0  ;;  %v411_v60 = vpop.f32.mrf.mxu1 }
 0x103   :  { %1745 = vtanh.f32 %v414_v47  ;;  %v415_v46 = vadd.f32 %v340_v61, %v241_v50  ;;  %v417_v1 = vadd.f32 %v411_v60, %v243_v56  ;;  %v3113_v56 = vld [vmem:[#allocation15_spill] sm:$0xff]  ;;  %v3114_v60 = vld [vmem:[#allocation16_spill] sm:$0xff] }
 0x105   :  { %1747 = vtanh.f32 %v415_v46 }
 0x106   :  { %1749 = vtanh.f32 %v416_v59 }
 0x107   :  { %1751 = vtanh.f32 %v417_v1  ;;  %v3115_v1 = vld [vmem:[#allocation17_spill] sm:$0xff] }
 0x110   :  { %v1746_v48 = vpop.eup %1745 }
 0x111   :  { %v422_v54 = vadd.f32 1.0, %v1746_v48  ;;  %v3116_v48 = vld [vmem:[#allocation18_spill] sm:$0xff] }
 0x112   :  { %v1748_v53 = vpop.eup %1747 }
 0x113   :  { %v423_v52 = vmul.f32 0.5, %v422_v54  ;;  %v424_v47 = vadd.f32 1.0, %v1748_v53  ;;  %v1750_v51 = vpop.eup %1749  ;;  %v3117_v54 = vld [vmem:[#allocation19_spill] sm:$0xff]  ;;  %v3118_v53 = vld [vmem:[#allocation20_spill] sm:$0xff] }
 0x114   :  { %v1752_v0 = vpop.eup %1751 }
 0x115   :  { %v425_v50 = vmul.f32 0.5, %v424_v47  ;;  %v429_v58 = vmul.f32 %v1750_v51, %v423_v52  ;;  %v426_v2 = vadd.f32 1.0, %v1752_v0  ;;  %v3111_v52 = vld [vmem:[#allocation13_spill] sm:$0xff]  ;;  %v3121_v51 = vld [vmem:[#allocation23_spill] sm:$0xff]  ;;  %v3124_v0 = vld [vmem:[#allocation26_spill] sm:$0xff] }
 0x116   :  { %v3119_v47 = vld [vmem:[#allocation21_spill] sm:$0xff] }
 0x117   :  { %v428_v61 = vmul.f32 0.0, %v425_v50  ;;  %v427_v49 = vmul.f32 0.5, %v426_v2  ;;  %v3120_v50 = vld [vmem:[#allocation22_spill] sm:$0xff]  ;;  %v3125_v2 = vld [vmem:[#allocation27_spill] sm:$0xff] }
 0x119   :  { %v2316_v46 = vadd.f32 %v429_v58, %v428_v61  ;;  %v3122_v61 = vld [vmem:[#allocation24_spill] sm:$0xff]  ;;  %v3123_v58 = vld [vmem:[#allocation25_spill] sm:$0xff] }
 0x11b   :  { %1753 = vtanh.f32 %v2316_v46 }
 0x128   :  { %v1754_v59 = vpop.eup %1753 }
 0x129   :  { %v432_v63 = vmul.f32 %v1754_v59, %v427_v49  ;;  %v3126_v49 = vld [vmem:[#allocation28_spill] sm:$0xff]  ;;  %v3127_v59 = vld [vmem:[#allocation29_spill] sm:$0xff] }
 0x12b   :  { %498 = vmatmul.mubr.f32.vlgmr.msra.gmra.mxu0 %v432_v63  ;;  %569 = vmatmul.mubr.f32.vlgmr.msra.gmra.mxu1 %v432_v63  ;;  %v3128_v63 = vld [vmem:[#allocation30_spill] sm:$0xff] }
 0x12c   :  { %595 = vmatpush1.msra.mxu0 %v2016_v4  ;;  %666 = vmatpush1.msra.mxu1 %v2020_v5 }
 0x12d   :  { %596 = vmatprep.subr.mxu0 %v2022_v6  ;;  %667 = vmatprep.subr.mxu1 %v2024_v7 }
 0x12e   :  { %597 = vmatpush1.msra.mxu0 %v2028_v8  ;;  %668 = vmatpush1.msra.mxu1 %v2030_v9 }
 0x12f   :  { %598 = vmatprep.subr.mxu0 %v2032_v10  ;;  %669 = vmatprep.subr.mxu1 %v2036_v11 }
 0x130   :  { %599 = vmatpush1.msra.mxu0 %v2038_v12  ;;  %670 = vmatpush1.msra.mxu1 %v2040_v13 }
 0x131   :  { %600 = vmatprep.subr.mxu0 %v2044_v14  ;;  %671 = vmatprep.subr.mxu1 %v2046_v15 }
 0x132   :  { %601 = vmatpush1.msra.mxu0 %v2050_v16  ;;  %672 = vmatpush1.msra.mxu1 %v2052_v17 }
 0x133   :  { %602 = vmatprep.subr.mxu0 %v2056_v18  ;;  %673 = vmatprep.subr.mxu1 %v2058_v19 }
 0x134   :  { %603 = vmatpush1.msra.mxu0 %v2062_v20  ;;  %674 = vmatpush1.msra.mxu1 %v2064_v21 }
 0x135   :  { %604 = vmatprep.subr.mxu0 %v2068_v22  ;;  %675 = vmatprep.subr.mxu1 %v2070_v23 }
 0x136   :  { %605 = vmatpush1.msra.mxu0 %v2074_v24  ;;  %676 = vmatpush1.msra.mxu1 %v2076_v25 }
 0x137   :  { %606 = vmatprep.subr.mxu0 %v2080_v26  ;;  %677 = vmatprep.subr.mxu1 %v2082_v27 }
 0x138   :  { %607 = vmatpush1.msra.mxu0 %v2086_v28  ;;  %678 = vmatpush1.msra.mxu1 %v2088_v29 }
 0x139   :  { %608 = vmatprep.subr.mxu0 %v2092_v30  ;;  %679 = vmatprep.subr.mxu1 %v2094_v31 }
 0x13a   :  { %609 = vmatpush1.msra.mxu0 %v2098_v32  ;;  %680 = vmatpush1.msra.mxu1 %v2100_v33 }
 0x13b   :  { %610 = vmatprep.subr.mxu0 %v2104_v34  ;;  %681 = vmatprep.subr.mxu1 %v2106_v35 }
 0x13c   :  { %611 = vmatpush1.msra.mxu0 %v2110_v36  ;;  %682 = vmatpush1.msra.mxu1 %v2112_v37 }
 0x13d   :  { %612 = vmatprep.subr.mxu0 %v2116_v38  ;;  %683 = vmatprep.subr.mxu1 %v2118_v39 }
 0x13e   :  { %613 = vmatpush1.msra.mxu0 %v2122_v40  ;;  %684 = vmatpush1.msra.mxu1 %v2124_v41 }
 0x13f   :  { %614 = vmatprep.subr.mxu0 %v2128_v42  ;;  %685 = vmatprep.subr.mxu1 %v2130_v43 }
 0x140   :  { %615 = vmatpush1.msra.mxu0 %v2134_v44  ;;  %686 = vmatpush1.msra.mxu1 %v3111_v52 }
 0x141   :  { %616 = vmatprep.subr.mxu0 %v3112_v3  ;;  %687 = vmatprep.subr.mxu1 %v3113_v56 }
 0x142   :  { %617 = vmatpush1.msra.mxu0 %v3114_v60  ;;  %688 = vmatpush1.msra.mxu1 %v3115_v1  ;;  %v3138_v60 = vld [vmem:[#allocation39_spill] sm:$0xff] }
 0x143   :  { %618 = vmatprep.subr.mxu0 %v3116_v48  ;;  %689 = vmatprep.subr.mxu1 %v3117_v54 }
 0x144   :  { %619 = vmatpush1.msra.mxu0 %v3118_v53  ;;  %690 = vmatpush1.msra.mxu1 %v3119_v47  ;;  %v3129_v53 = vld [vmem:[#allocation31_spill] sm:$0xff]  ;;  %v3130_v47 = vld [vmem:[#allocation32_spill] sm:$0xff] }
 0x145   :  { %620 = vmatprep.subr.mxu0 %v3120_v50  ;;  %691 = vmatprep.subr.mxu1 %v3121_v51  ;;  %v3131_v50 = vmov 0.0   ;;  %v3132_v51 = vld [vmem:[#allocation33_spill] sm:$0xff] }
 0x146   :  { %621 = vmatpush1.msra.mxu0 %v3122_v61  ;;  %692 = vmatpush1.msra.mxu1 %v3123_v58  ;;  %v3133_v58 = vld [vmem:[#allocation11_spill] sm:$0xff] }
 0x147   :  { %622 = vmatprep.subr.mxu0 %v3124_v0  ;;  %693 = vmatprep.subr.mxu1 %v3125_v2  ;;  %v3134_v0 = vld [vmem:[#allocation12_spill] sm:$0xff]  ;;  %v3137_v2 = vld [vmem:[#allocation37_spill] sm:$0xff] }
 0x148   :  { %623 = vmatpush1.msra.mxu0 %v3126_v49  ;;  %694 = vmatpush1.msra.mxu1 %v3127_v59  ;;  %v118_v59 = vld [vmem:[%s2957_s0 + $0x10] sm:$0xff] }
 0x149   :  { %624 = vmatprep.subr.mxu0 %v3128_v63  ;;  %695 = vmatprep.subr.mxu1 %v3129_v53  ;;  %v119_v53 = vld [vmem:[%s2957_s0 + $0x18] sm:$0xff]  ;;  %v3136_v63 = vld [vmem:[#allocation35_spill] sm:$0xff] }
 0x14a   :  { %625 = vmatpush1.msra.mxu0 %v3130_v47  ;;  %658 = vmatprep.mubr.f32.mxu0 %v3131_v50 }
 0x14b   :  { %696 = vmatpush1.msra.mxu1 %v3132_v51  ;;  %729 = vmatprep.mubr.f32.mxu1 %v3131_v50  ;;  %v121_v51 = vld [vmem:[%s2957_s0 + $0x28] sm:$0xff]  ;;  %v3135_v50 = vld [vmem:[#allocation34_spill] sm:$0xff] }
 0x14c   :  { %755 = vmatprep.subr.mxu0 %v3133_v58  ;;  %826 = vmatprep.subr.mxu1 %v3134_v0  ;;  %v123_v58 = vld [vmem:[%s2957_s0 + $0x38] sm:$0xff]  ;;  %v133_v0 = vpop.permute.xlu0 %132 }
 0x14d   :  { %137 = vperm.xlu1 %1744, %v118_v59   ;;  %v190_v47 = vmul.f32 %v3135_v50, %v133_v0  ;;  %v191_v59 = vmul.f32 %v3136_v63, %v133_v0  ;;  %v192_v61 = vmul.f32 %v3137_v2, %v133_v0  ;;  %v193_v50 = vmul.f32 %v2310_v45, %v133_v0 }
 0x14f   :  { %v244_v49 = vadd.f32 %v2297_v57, %v190_v47  ;;  %v245_v48 = vadd.f32 %v2302_v55, %v191_v59  ;;  %v246_v56 = vadd.f32 %v3138_v60, %v192_v61  ;;  %v247_v47 = vadd.f32 %v2313_v62, %v193_v50 }
 0x151   :  { %142 = vperm.xlu1 %1744, %v119_v53  }
 0x155   :  { %152 = vperm.xlu1 %1744, %v121_v51  }
 0x159   :  { %162 = vperm.xlu1 %1744, %v123_v58  }
 0x1eb   :  { %v499_v53 = vpop.f32.mrf.mxu0  ;;  %v570_v1 = vpop.f32.mrf.mxu1 }
 0x1ec   :  { %v575_v54 = vadd.f32 %v499_v53, %v244_v49  ;;  %v577_v58 = vadd.f32 %v570_v1, %v246_v56 }
 0x1ed   :  { %v501_v51 = vpop.f32.mrf.mxu0  ;;  %v572_v63 = vpop.f32.mrf.mxu1 }
 0x1ee   :  { %1755 = vtanh.f32 %v575_v54  ;;  %v576_v3 = vadd.f32 %v501_v51, %v245_v48  ;;  %v578_v57 = vadd.f32 %v572_v63, %v247_v47  ;;  %v3144_v51 = vld [vmem:[#allocation18_spill] sm:$0xff]  ;;  %v3146_v47 = vld [vmem:[#allocation20_spill] sm:$0xff] }
 0x1f0   :  { %1757 = vtanh.f32 %v576_v3 }
 0x1f1   :  { %1759 = vtanh.f32 %v577_v58  ;;  %v3145_v58 = vld [vmem:[#allocation19_spill] sm:$0xff] }
 0x1f2   :  { %1761 = vtanh.f32 %v578_v57  ;;  %v3140_v57 = vld [vmem:[#allocation14_spill] sm:$0xff] }
 0x1fb   :  { %v1756_v2 = vpop.eup %1755 }
 0x1fc   :  { %v583_v52 = vadd.f32 1.0, %v1756_v2  ;;  %v3143_v2 = vld [vmem:[#allocation17_spill] sm:$0xff] }
 0x1fd   :  { %v1758_v49 = vpop.eup %1757 }
 0x1fe   :  { %v584_v53 = vmul.f32 0.5, %v583_v52  ;;  %v585_v59 = vadd.f32 1.0, %v1758_v49  ;;  %v1760_v54 = vpop.eup %1759  ;;  %v3142_v52 = vld [vmem:[#allocation16_spill] sm:$0xff]  ;;  %v3147_v49 = vld [vmem:[#allocation21_spill] sm:$0xff] }
 0x1ff   :  { %v1762_v3 = vpop.eup %1761 }
 0x200   :  { %v586_v55 = vmul.f32 0.5, %v585_v59  ;;  %v590_v48 = vmul.f32 %v1760_v54, %v584_v53  ;;  %v587_v1 = vadd.f32 1.0, %v1762_v3  ;;  %v3148_v53 = vld [vmem:[#allocation22_spill] sm:$0xff]  ;;  %v3149_v59 = vld [vmem:[#allocation23_spill] sm:$0xff]  ;;  %v3150_v54 = vld [vmem:[#allocation24_spill] sm:$0xff] }
 0x201   :  { %v3153_v3 = vld [vmem:[#allocation27_spill] sm:$0xff] }
 0x202   :  { %v589_v61 = vmul.f32 %v586_v55, %v2316_v46  ;;  %v588_v0 = vmul.f32 0.5, %v587_v1  ;;  %v3139_v55 = vld [vmem:[#allocation13_spill] sm:$0xff]  ;;  %v3141_v46 = vld [vmem:[#allocation15_spill] sm:$0xff]  ;;  %v3154_v1 = vld [vmem:[#allocation28_spill] sm:$0xff] }
 0x204   :  { %v2406_v56 = vadd.f32 %v590_v48, %v589_v61  ;;  %v3151_v61 = vld [vmem:[#allocation25_spill] sm:$0xff]  ;;  %v3152_v48 = vld [vmem:[#allocation26_spill] sm:$0xff] }
 0x206   :  { %1763 = vtanh.f32 %v2406_v56 }
 0x213   :  { %v1764_v50 = vpop.eup %1763 }
 0x214   :  { %v593_v63 = vmul.f32 %v1764_v50, %v588_v0  ;;  %v3155_v0 = vld [vmem:[#allocation29_spill] sm:$0xff]  ;;  %v3156_v50 = vld [vmem:[#allocation30_spill] sm:$0xff] }
 0x216   :  { %659 = vmatmul.mubr.f32.vlgmr.msra.gmra.mxu0 %v593_v63  ;;  %730 = vmatmul.mubr.f32.vlgmr.msra.gmra.mxu1 %v593_v63  ;;  %v3157_v63 = vld [vmem:[#allocation31_spill] sm:$0xff] }
 0x217   :  { %756 = vmatpush1.msra.mxu0 %v2016_v4  ;;  %827 = vmatpush1.msra.mxu1 %v2020_v5 }
 0x218   :  { %757 = vmatprep.subr.mxu0 %v2022_v6  ;;  %828 = vmatprep.subr.mxu1 %v2024_v7 }
 0x219   :  { %758 = vmatpush1.msra.mxu0 %v2028_v8  ;;  %829 = vmatpush1.msra.mxu1 %v2030_v9 }
 0x21a   :  { %759 = vmatprep.subr.mxu0 %v2032_v10  ;;  %830 = vmatprep.subr.mxu1 %v2036_v11 }
 0x21b   :  { %760 = vmatpush1.msra.mxu0 %v2038_v12  ;;  %831 = vmatpush1.msra.mxu1 %v2040_v13 }
 0x21c   :  { %761 = vmatprep.subr.mxu0 %v2044_v14  ;;  %832 = vmatprep.subr.mxu1 %v2046_v15 }
 0x21d   :  { %762 = vmatpush1.msra.mxu0 %v2050_v16  ;;  %833 = vmatpush1.msra.mxu1 %v2052_v17 }
 0x21e   :  { %763 = vmatprep.subr.mxu0 %v2056_v18  ;;  %834 = vmatprep.subr.mxu1 %v2058_v19 }
 0x21f   :  { %764 = vmatpush1.msra.mxu0 %v2062_v20  ;;  %835 = vmatpush1.msra.mxu1 %v2064_v21 }
 0x220   :  { %765 = vmatprep.subr.mxu0 %v2068_v22  ;;  %836 = vmatprep.subr.mxu1 %v2070_v23 }
 0x221   :  { %766 = vmatpush1.msra.mxu0 %v2074_v24  ;;  %837 = vmatpush1.msra.mxu1 %v2076_v25 }
 0x222   :  { %767 = vmatprep.subr.mxu0 %v2080_v26  ;;  %838 = vmatprep.subr.mxu1 %v2082_v27 }
 0x223   :  { %768 = vmatpush1.msra.mxu0 %v2086_v28  ;;  %839 = vmatpush1.msra.mxu1 %v2088_v29 }
 0x224   :  { %769 = vmatprep.subr.mxu0 %v2092_v30  ;;  %840 = vmatprep.subr.mxu1 %v2094_v31 }
 0x225   :  { %770 = vmatpush1.msra.mxu0 %v2098_v32  ;;  %841 = vmatpush1.msra.mxu1 %v2100_v33 }
 0x226   :  { %771 = vmatprep.subr.mxu0 %v2104_v34  ;;  %842 = vmatprep.subr.mxu1 %v2106_v35 }
 0x227   :  { %772 = vmatpush1.msra.mxu0 %v2110_v36  ;;  %843 = vmatpush1.msra.mxu1 %v2112_v37 }
 0x228   :  { %773 = vmatprep.subr.mxu0 %v2116_v38  ;;  %844 = vmatprep.subr.mxu1 %v2118_v39 }
 0x229   :  { %774 = vmatpush1.msra.mxu0 %v2122_v40  ;;  %845 = vmatpush1.msra.mxu1 %v2124_v41 }
 0x22a   :  { %775 = vmatprep.subr.mxu0 %v2128_v42  ;;  %846 = vmatprep.subr.mxu1 %v2130_v43 }
 0x22b   :  { %776 = vmatpush1.msra.mxu0 %v2134_v44  ;;  %847 = vmatpush1.msra.mxu1 %v3139_v55 }
 0x22c   :  { %777 = vmatprep.subr.mxu0 %v3140_v57  ;;  %848 = vmatprep.subr.mxu1 %v3141_v46 }
 0x22d   :  { %778 = vmatpush1.msra.mxu0 %v3142_v52  ;;  %849 = vmatpush1.msra.mxu1 %v3143_v2 }
 0x22e   :  { %779 = vmatprep.subr.mxu0 %v3144_v51  ;;  %850 = vmatprep.subr.mxu1 %v3145_v58 }
 0x22f   :  { %780 = vmatpush1.msra.mxu0 %v3146_v47  ;;  %851 = vmatpush1.msra.mxu1 %v3147_v49  ;;  %v3158_v49 = vld [vmem:[#allocation32_spill] sm:$0xff] }
 0x230   :  { %781 = vmatprep.subr.mxu0 %v3148_v53  ;;  %852 = vmatprep.subr.mxu1 %v3149_v59  ;;  %v3159_v53 = vmov 0.0   ;;  %v3160_v59 = vld [vmem:[#allocation33_spill] sm:$0xff] }
 0x231   :  { %782 = vmatpush1.msra.mxu0 %v3150_v54  ;;  %853 = vmatpush1.msra.mxu1 %v3151_v61  ;;  %v3161_v61 = vld [vmem:[#allocation11_spill] sm:$0xff] }
 0x232   :  { %783 = vmatprep.subr.mxu0 %v3152_v48  ;;  %854 = vmatprep.subr.mxu1 %v3153_v3  ;;  %v3162_v48 = vld [vmem:[#allocation12_spill] sm:$0xff]  ;;  %v138_v3 = vpop.permute.xlu1 %137 }
 0x233   :  { %784 = vmatpush1.msra.mxu0 %v3154_v1  ;;  %855 = vmatpush1.msra.mxu1 %v3155_v0  ;;  %v3163_v1 = vld [vmem:[#allocation34_spill] sm:$0xff]  ;;  %v3164_v0 = vld [vmem:[#allocation35_spill] sm:$0xff] }
 0x234   :  { %785 = vmatprep.subr.mxu0 %v3156_v50  ;;  %856 = vmatprep.subr.mxu1 %v3157_v63  ;;  %v194_v54 = vmul.f32 %v3163_v1, %v138_v3  ;;  %v195_v47 = vmul.f32 %v3164_v0, %v138_v3  ;;  %v3165_v50 = vld [vmem:[#allocation36_spill] sm:$0xff]  ;;  %v3166_v63 = vld [vmem:[#allocation37_spill] sm:$0xff]  ;;  %v197_v1 = vmul.f32 %v2310_v45, %v138_v3 }
 0x235   :  { %786 = vmatpush1.msra.mxu0 %v3158_v49  ;;  %819 = vmatprep.mubr.f32.mxu0 %v3159_v53  ;;  %v196_v51 = vmul.f32 %v3166_v63, %v138_v3  ;;  %v3167_v49 = vld [vmem:[#allocation38_spill] sm:$0xff] }
 0x236   :  { %857 = vmatpush1.msra.mxu1 %v3160_v59  ;;  %890 = vmatprep.mubr.f32.mxu1 %v3159_v53  ;;  %v248_v58 = vadd.f32 %v3165_v50, %v194_v54  ;;  %v249_v2 = vadd.f32 %v3167_v49, %v195_v47  ;;  %v251_v0 = vadd.f32 %v2313_v62, %v197_v1 }
 0x237   :  { %916 = vmatprep.subr.mxu0 %v3161_v61  ;;  %987 = vmatprep.subr.mxu1 %v3162_v48  ;;  %v250_v59 = vadd.f32 %v3138_v60, %v196_v51 }
 0x2d6   :  { %v660_v52 = vpop.f32.mrf.mxu0  ;;  %v731_v53 = vpop.f32.mrf.mxu1 }
 0x2d7   :  { %v736_v46 = vadd.f32 %v660_v52, %v248_v58  ;;  %v738_v48 = vadd.f32 %v731_v53, %v250_v59 }
 0x2d8   :  { %v662_v57 = vpop.f32.mrf.mxu0  ;;  %v733_v54 = vpop.f32.mrf.mxu1 }
 0x2d9   :  { %1765 = vtanh.f32 %v736_v46  ;;  %v737_v61 = vadd.f32 %v662_v57, %v249_v2  ;;  %v739_v50 = vadd.f32 %v733_v54, %v251_v0 }
 0x2db   :  { %1767 = vtanh.f32 %v737_v61 }
 0x2dc   :  { %1769 = vtanh.f32 %v738_v48 }
 0x2dd   :  { %1771 = vtanh.f32 %v739_v50 }
 0x2e6   :  { %v1766_v63 = vpop.eup %1765 }
 0x2e7   :  { %v744_v55 = vadd.f32 1.0, %v1766_v63 }
 0x2e8   :  { %v1768_v47 = vpop.eup %1767 }
 0x2e9   :  { %v745_v49 = vmul.f32 0.5, %v744_v55  ;;  %v746_v52 = vadd.f32 1.0, %v1768_v47  ;;  %v1770_v58 = vpop.eup %1769 }
 0x2ea   :  { %v1772_v53 = vpop.eup %1771 }
 0x2eb   :  { %v747_v51 = vmul.f32 0.5, %v746_v52  ;;  %v751_v57 = vmul.f32 %v1770_v58, %v745_v49  ;;  %v748_v59 = vadd.f32 1.0, %v1772_v53 }
 0x2ed   :  { %v750_v46 = vmul.f32 %v747_v51, %v2406_v56  ;;  %v749_v3 = vmul.f32 0.5, %v748_v59 }
 0x2ef   :  { %v2484_v2 = vadd.f32 %v751_v57, %v750_v46 }
 0x2f1   :  { %1773 = vtanh.f32 %v2484_v2 }
 0x2fe   :  { %v1774_v1 = vpop.eup %1773 }
 0x2ff   :  { %v754_v0 = vmul.f32 %v1774_v1, %v749_v3 }
 0x301   :  { %820 = vmatmul.mubr.f32.vlgmr.msra.gmra.mxu0 %v754_v0  ;;  %891 = vmatmul.mubr.f32.vlgmr.msra.gmra.mxu1 %v754_v0 }
 0x302   :  { %917 = vmatpush1.msra.mxu0 %v2016_v4  ;;  %988 = vmatpush1.msra.mxu1 %v2020_v5  ;;  %v3168_v4 = vld [vmem:[#allocation13_spill] sm:$0xff]  ;;  %v3169_v5 = vld [vmem:[#allocation14_spill] sm:$0xff] }
 0x303   :  { %918 = vmatprep.subr.mxu0 %v2022_v6  ;;  %989 = vmatprep.subr.mxu1 %v2024_v7  ;;  %v3170_v6 = vld [vmem:[#allocation15_spill] sm:$0xff]  ;;  %v3171_v7 = vld [vmem:[#allocation16_spill] sm:$0xff] }
 0x304   :  { %919 = vmatpush1.msra.mxu0 %v2028_v8  ;;  %990 = vmatpush1.msra.mxu1 %v2030_v9  ;;  %v3172_v8 = vld [vmem:[#allocation17_spill] sm:$0xff]  ;;  %v3173_v9 = vld [vmem:[#allocation18_spill] sm:$0xff] }
 0x305   :  { %920 = vmatprep.subr.mxu0 %v2032_v10  ;;  %991 = vmatprep.subr.mxu1 %v2036_v11  ;;  %v3174_v10 = vld [vmem:[#allocation19_spill] sm:$0xff]  ;;  %v3175_v11 = vld [vmem:[#allocation20_spill] sm:$0xff] }
 0x306   :  { %921 = vmatpush1.msra.mxu0 %v2038_v12  ;;  %992 = vmatpush1.msra.mxu1 %v2040_v13  ;;  %v3176_v12 = vld [vmem:[#allocation21_spill] sm:$0xff]  ;;  %v3177_v13 = vld [vmem:[#allocation22_spill] sm:$0xff] }
 0x307   :  { %922 = vmatprep.subr.mxu0 %v2044_v14  ;;  %993 = vmatprep.subr.mxu1 %v2046_v15  ;;  %v3178_v14 = vld [vmem:[#allocation23_spill] sm:$0xff]  ;;  %v3179_v15 = vld [vmem:[#allocation24_spill] sm:$0xff] }
 0x308   :  { %923 = vmatpush1.msra.mxu0 %v2050_v16  ;;  %994 = vmatpush1.msra.mxu1 %v2052_v17  ;;  %v3180_v16 = vld [vmem:[#allocation25_spill] sm:$0xff]  ;;  %v3181_v17 = vld [vmem:[#allocation26_spill] sm:$0xff] }
 0x309   :  { %924 = vmatprep.subr.mxu0 %v2056_v18  ;;  %995 = vmatprep.subr.mxu1 %v2058_v19  ;;  %v3182_v18 = vld [vmem:[#allocation27_spill] sm:$0xff]  ;;  %v3183_v19 = vld [vmem:[#allocation28_spill] sm:$0xff] }
 0x30a   :  { %925 = vmatpush1.msra.mxu0 %v2062_v20  ;;  %996 = vmatpush1.msra.mxu1 %v2064_v21  ;;  %v3184_v20 = vld [vmem:[#allocation29_spill] sm:$0xff]  ;;  %v3185_v21 = vld [vmem:[#allocation30_spill] sm:$0xff] }
 0x30b   :  { %926 = vmatprep.subr.mxu0 %v2068_v22  ;;  %997 = vmatprep.subr.mxu1 %v2070_v23  ;;  %v3186_v22 = vld [vmem:[#allocation31_spill] sm:$0xff]  ;;  %v3187_v23 = vld [vmem:[#allocation32_spill] sm:$0xff] }
 0x30c   :  { %927 = vmatpush1.msra.mxu0 %v2074_v24  ;;  %998 = vmatpush1.msra.mxu1 %v2076_v25  ;;  %v3188_v24 = vmov 0.0   ;;  %v3189_v25 = vld [vmem:[#allocation33_spill] sm:$0xff] }
 0x30d   :  { %928 = vmatprep.subr.mxu0 %v2080_v26  ;;  %999 = vmatprep.subr.mxu1 %v2082_v27  ;;  %v2551_v26 = vld [vmem:[#allocation2 + $0x1e8] sm:$0xff]  ;;  %v2554_v27 = vld [vmem:[#allocation2 + $0x1f8] sm:$0xff] }
 0x30e   :  { %929 = vmatpush1.msra.mxu0 %v2086_v28  ;;  %1000 = vmatpush1.msra.mxu1 %v2088_v29  ;;  %3190 = vst [vmem:[#allocation39_spill] sm:$0xff] %v2551_v26  ;;  %3191 = vst [vmem:[#allocation11_spill] sm:$0xff] %v2554_v27  ;;  %v143_v28 = vpop.permute.xlu1 %142  ;;  %v3192_v29 = vld [vmem:[#allocation34_spill] sm:$0xff] }
 0x30f   :  { %930 = vmatprep.subr.mxu0 %v2092_v30  ;;  %1001 = vmatprep.subr.mxu1 %v2094_v31  ;;  %v198_v30 = vmul.f32 %v3192_v29, %v143_v28  ;;  %v3193_v31 = vld [vmem:[#allocation35_spill] sm:$0xff]  ;;  %v201_v55 = vmul.f32 %v2310_v45, %v143_v28 }
 0x310   :  { %931 = vmatpush1.msra.mxu0 %v2098_v32  ;;  %1002 = vmatpush1.msra.mxu1 %v2100_v33  ;;  %v199_v32 = vmul.f32 %v3193_v31, %v143_v28  ;;  %v3194_v33 = vld [vmem:[#allocation36_spill] sm:$0xff] }
 0x311   :  { %932 = vmatprep.subr.mxu0 %v2104_v34  ;;  %1003 = vmatprep.subr.mxu1 %v2106_v35  ;;  %v252_v34 = vadd.f32 %v3194_v33, %v198_v30  ;;  %v3195_v35 = vld [vmem:[#allocation37_spill] sm:$0xff]  ;;  %v255_v50 = vadd.f32 %v2313_v62, %v201_v55  ;;  %v2635_v30 = vld [vmem:[#allocation2 + $0x128] sm:$0xff] }
 0x312   :  { %933 = vmatpush1.msra.mxu0 %v2110_v36  ;;  %1004 = vmatpush1.msra.mxu1 %v2112_v37  ;;  %v200_v36 = vmul.f32 %v3195_v35, %v143_v28  ;;  %v2632_v28 = vld [vmem:[#allocation2 + $0x150] sm:$0xff]  ;;  %v2671_v55 = vld [vmem:[#allocation2 + $0xc8] sm:$0xff] }
 0x313   :  { %934 = vmatprep.subr.mxu0 %v2116_v38  ;;  %1005 = vmatprep.subr.mxu1 %v2118_v39  ;;  %v3196_v39 = vld [vmem:[#allocation38_spill] sm:$0xff] }
 0x314   :  { %935 = vmatpush1.msra.mxu0 %v2122_v40  ;;  %1006 = vmatpush1.msra.mxu1 %v2124_v41  ;;  %v253_v40 = vadd.f32 %v3196_v39, %v199_v32  ;;  %v2638_v32 = vld [vmem:[#allocation2 + $0x138] sm:$0xff] }
 0x315   :  { %936 = vmatprep.subr.mxu0 %v2128_v42  ;;  %1007 = vmatprep.subr.mxu1 %v2130_v43  ;;  %v254_v43 = vadd.f32 %v3138_v60, %v200_v36  ;;  %v2644_v36 = vld [vmem:[#allocation2 + $0x130] sm:$0xff] }
 0x316   :  { %937 = vmatpush1.msra.mxu0 %v2134_v44  ;;  %1008 = vmatpush1.msra.mxu1 %v3168_v4 }
 0x317   :  { %938 = vmatprep.subr.mxu0 %v3169_v5  ;;  %1009 = vmatprep.subr.mxu1 %v3170_v6  ;;  %v2569_v5 = vld [vmem:[#allocation2 + $0x1e0] sm:$0xff]  ;;  %v2572_v6 = vld [vmem:[#allocation2 + $0x1f0] sm:$0xff] }
 0x318   :  { %939 = vmatpush1.msra.mxu0 %v3171_v7  ;;  %1010 = vmatpush1.msra.mxu1 %v3172_v8  ;;  %v2578_v7 = vld [vmem:[#allocation2 + $0x1d8] sm:$0xff]  ;;  %v2581_v8 = vld [vmem:[#allocation2 + $0x1c0] sm:$0xff] }
 0x319   :  { %940 = vmatprep.subr.mxu0 %v3173_v9  ;;  %1011 = vmatprep.subr.mxu1 %v3174_v10  ;;  %v2584_v9 = vld [vmem:[#allocation2 + $0x1d0] sm:$0xff]  ;;  %v2587_v10 = vld [vmem:[#allocation2 + $0x1a8] sm:$0xff] }
 0x31a   :  { %941 = vmatpush1.msra.mxu0 %v3175_v11  ;;  %1012 = vmatpush1.msra.mxu1 %v3176_v12  ;;  %v2590_v11 = vld [vmem:[#allocation2 + $0x1b8] sm:$0xff]  ;;  %v2593_v12 = vld [vmem:[#allocation2 + $0x1a0] sm:$0xff] }
 0x31b   :  { %942 = vmatprep.subr.mxu0 %v3177_v13  ;;  %1013 = vmatprep.subr.mxu1 %v3178_v14  ;;  %v2596_v13 = vld [vmem:[#allocation2 + $0x1b0] sm:$0xff]  ;;  %v2599_v14 = vld [vmem:[#allocation2 + $0x188] sm:$0xff] }
 0x31c   :  { %943 = vmatpush1.msra.mxu0 %v3179_v15  ;;  %1014 = vmatpush1.msra.mxu1 %v3180_v16  ;;  %v2602_v15 = vld [vmem:[#allocation2 + $0x198] sm:$0xff]  ;;  %v2605_v16 = vld [vmem:[#allocation2 + $0x180] sm:$0xff] }
 0x31d   :  { %944 = vmatprep.subr.mxu0 %v3181_v17  ;;  %1015 = vmatprep.subr.mxu1 %v3182_v18  ;;  %v2608_v17 = vld [vmem:[#allocation2 + $0x190] sm:$0xff]  ;;  %v2611_v18 = vld [vmem:[#allocation2 + $0x168] sm:$0xff] }
 0x31e   :  { %945 = vmatpush1.msra.mxu0 %v3183_v19  ;;  %1016 = vmatpush1.msra.mxu1 %v3184_v20  ;;  %v2614_v19 = vld [vmem:[#allocation2 + $0x178] sm:$0xff]  ;;  %v2617_v20 = vld [vmem:[#allocation2 + $0x160] sm:$0xff] }
 0x31f   :  { %946 = vmatprep.subr.mxu0 %v3185_v21  ;;  %1017 = vmatprep.subr.mxu1 %v3186_v22  ;;  %v2620_v21 = vld [vmem:[#allocation2 + $0x170] sm:$0xff]  ;;  %v2623_v22 = vld [vmem:[#allocation2 + $0x148] sm:$0xff] }
 0x320   :  { %947 = vmatpush1.msra.mxu0 %v3187_v23  ;;  %980 = vmatprep.mubr.f32.mxu0 %v3188_v24  ;;  %v2626_v23 = vld [vmem:[#allocation2 + $0x158] sm:$0xff] }
 0x321   :  { %1018 = vmatpush1.msra.mxu1 %v3189_v25  ;;  %1051 = vmatprep.mubr.f32.mxu1 %v3188_v24  ;;  %v2629_v25 = vld [vmem:[#allocation2 + $0x140] sm:$0xff] }
 0x322   :  { %1077 = vmatprep.subr.mxu0 %v2551_v26  ;;  %1148 = vmatprep.subr.mxu1 %v2554_v27 }
 0x3c1   :  { %v821_v37 = vpop.f32.mrf.mxu0  ;;  %v892_v41 = vpop.f32.mrf.mxu1 }
 0x3c2   :  { %v897_v38 = vadd.f32 %v821_v37, %v252_v34  ;;  %v899_v56 = vadd.f32 %v892_v41, %v254_v43  ;;  %v2641_v34 = vld [vmem:[#allocation2 + $0x120] sm:$0xff]  ;;  %v2647_v37 = vld [vmem:[#allocation2 + $0x108] sm:$0xff]  ;;  %v2656_v41 = vld [vmem:[#allocation2 + $0x110] sm:$0xff] }
 0x3c3   :  { %v823_v42 = vpop.f32.mrf.mxu0  ;;  %v894_v49 = vpop.f32.mrf.mxu1  ;;  %v2662_v43 = vld [vmem:[#allocation2 + $0xf8] sm:$0xff] }
 0x3c4   :  { %1775 = vtanh.f32 %v897_v38  ;;  %v898_v44 = vadd.f32 %v823_v42, %v253_v40  ;;  %v900_v63 = vadd.f32 %v894_v49, %v255_v50  ;;  %v2650_v38 = vld [vmem:[#allocation2 + $0x118] sm:$0xff]  ;;  %v2653_v40 = vld [vmem:[#allocation2 + $0x100] sm:$0xff]  ;;  %v2659_v42 = vld [vmem:[#allocation2 + $0xe8] sm:$0xff] }
 0x3c5   :  { %v2674_v49 = vld [vmem:[#allocation2 + $0xd8] sm:$0xff]  ;;  %v2677_v50 = vld [vmem:[#allocation2 + $0xc0] sm:$0xff] }
 0x3c6   :  { %1777 = vtanh.f32 %v898_v44  ;;  %v2665_v44 = vld [vmem:[#allocation2 + $0xe0] sm:$0xff] }
 0x3c7   :  { %1779 = vtanh.f32 %v899_v56  ;;  %v2668_v56 = vld [vmem:[#allocation2 + $0xf0] sm:$0xff] }
 0x3c8   :  { %1781 = vtanh.f32 %v900_v63  ;;  %v2680_v63 = vld [vmem:[#allocation2 + $0xd0] sm:$0xff] }
 0x3d1   :  { %v1776_v61 = vpop.eup %1775 }
 0x3d2   :  { %v905_v48 = vadd.f32 1.0, %v1776_v61  ;;  %v2683_v61 = vld [vmem:[#allocation2 + $0xa8] sm:$0xff] }
 0x3d3   :  { %v1778_v54 = vpop.eup %1777 }
 0x3d4   :  { %v906_v47 = vmul.f32 0.5, %v905_v48  ;;  %v907_v52 = vadd.f32 1.0, %v1778_v54  ;;  %v1780_v58 = vpop.eup %1779  ;;  %v2686_v48 = vld [vmem:[#allocation2 + $0xb8] sm:$0xff]  ;;  %v2689_v54 = vld [vmem:[#allocation2 + $0xa0] sm:$0xff] }
 0x3d5   :  { %v1782_v59 = vpop.eup %1781 }
 0x3d6   :  { %v908_v51 = vmul.f32 0.5, %v907_v52  ;;  %v912_v57 = vmul.f32 %v1780_v58, %v906_v47  ;;  %v909_v3 = vadd.f32 1.0, %v1782_v59  ;;  %v2692_v47 = vld [vmem:[#allocation2 + $0xb0] sm:$0xff]  ;;  %v2695_v52 = vld [vmem:[#allocation2 + $0x88] sm:$0xff]  ;;  %v2701_v58 = vld [vmem:[#allocation2 + $0x80] sm:$0xff] }
 0x3d7   :  { %3197 = vst [vmem:[#allocation12_spill] sm:$0xff] %v2692_v47  ;;  %3198 = vst [vmem:[#allocation13_spill] sm:$0xff] %v2695_v52  ;;  %v2710_v59 = vld [vmem:[#allocation2 + $0x78] sm:$0xff] }
 0x3d8   :  { %v911_v46 = vmul.f32 %v908_v51, %v2484_v2  ;;  %v910_v1 = vmul.f32 0.5, %v909_v3  ;;  %v2575_v2 = vld [vmem:[#allocation2 + $0x1c8] sm:$0xff]  ;;  %v2698_v51 = vld [vmem:[#allocation2 + $0x98] sm:$0xff]  ;;  %3200 = vst [vmem:[#allocation15_spill] sm:$0xff] %v2701_v58  ;;  %3203 = vst [vmem:[#allocation18_spill] sm:$0xff] %v2710_v59 }
 0x3d9   :  { %3199 = vst [vmem:[#allocation14_spill] sm:$0xff] %v2698_v51  ;;  %v2713_v3 = vld [vmem:[#allocation2 + $0x60] sm:$0xff] }
 0x3da   :  { %v2566_v53 = vadd.f32 %v912_v57, %v911_v46  ;;  %v2704_v46 = vld [vmem:[#allocation2 + $0x90] sm:$0xff]  ;;  %v2707_v57 = vld [vmem:[#allocation2 + $0x68] sm:$0xff]  ;;  %3204 = vst [vmem:[#allocation19_spill] sm:$0xff] %v2713_v3 }
 0x3db   :  { %3201 = vst [vmem:[#allocation16_spill] sm:$0xff] %v2704_v46  ;;  %3202 = vst [vmem:[#allocation17_spill] sm:$0xff] %v2707_v57 }
 0x3dc   :  { %1783 = vtanh.f32 %v2566_v53 }
 0x3e9   :  { %v1784_v0 = vpop.eup %1783 }
 0x3ea   :  { %v915_v4 = vmul.f32 %v1784_v0, %v910_v1  ;;  %v2716_v1 = vld [vmem:[#allocation2 + $0x70] sm:$0xff]  ;;  %v2719_v0 = vld [vmem:[#allocation2 + $0x48] sm:$0xff] }
 0x3eb   :  { %3205 = vst [vmem:[#allocation20_spill] sm:$0xff] %v2716_v1  ;;  %3206 = vst [vmem:[#allocation21_spill] sm:$0xff] %v2719_v0 }
 0x3ec   :  { %981 = vmatmul.mubr.f32.vlgmr.msra.gmra.mxu0 %v915_v4  ;;  %1052 = vmatmul.mubr.f32.vlgmr.msra.gmra.mxu1 %v915_v4  ;;  %v2722_v4 = vld [vmem:[#allocation2 + $0x58] sm:$0xff] }
 0x3ed   :  { %1078 = vmatpush1.msra.mxu0 %v2569_v5  ;;  %1149 = vmatpush1.msra.mxu1 %v2572_v6  ;;  %3207 = vst [vmem:[#allocation22_spill] sm:$0xff] %v2722_v4 }
 0x3ee   :  { %1079 = vmatprep.subr.mxu0 %v2575_v2  ;;  %1150 = vmatprep.subr.mxu1 %v2578_v7 }
 0x3ef   :  { %1080 = vmatpush1.msra.mxu0 %v2581_v8  ;;  %1151 = vmatpush1.msra.mxu1 %v2584_v9 }
 0x3f0   :  { %1081 = vmatprep.subr.mxu0 %v2587_v10  ;;  %1152 = vmatprep.subr.mxu1 %v2590_v11 }
 0x3f1   :  { %1082 = vmatpush1.msra.mxu0 %v2593_v12  ;;  %1153 = vmatpush1.msra.mxu1 %v2596_v13 }
 0x3f2   :  { %1083 = vmatprep.subr.mxu0 %v2599_v14  ;;  %1154 = vmatprep.subr.mxu1 %v2602_v15 }
 0x3f3   :  { %1084 = vmatpush1.msra.mxu0 %v2605_v16  ;;  %1155 = vmatpush1.msra.mxu1 %v2608_v17 }
 0x3f4   :  { %1085 = vmatprep.subr.mxu0 %v2611_v18  ;;  %1156 = vmatprep.subr.mxu1 %v2614_v19 }
 0x3f5   :  { %1086 = vmatpush1.msra.mxu0 %v2617_v20  ;;  %1157 = vmatpush1.msra.mxu1 %v2620_v21 }
 0x3f6   :  { %1087 = vmatprep.subr.mxu0 %v2623_v22  ;;  %1158 = vmatprep.subr.mxu1 %v2626_v23 }
 0x3f7   :  { %1088 = vmatpush1.msra.mxu0 %v2629_v25  ;;  %1159 = vmatpush1.msra.mxu1 %v2632_v28 }
 0x3f8   :  { %1089 = vmatprep.subr.mxu0 %v2635_v30  ;;  %1160 = vmatprep.subr.mxu1 %v2638_v32 }
 0x3f9   :  { %1090 = vmatpush1.msra.mxu0 %v2641_v34  ;;  %1161 = vmatpush1.msra.mxu1 %v2644_v36 }
 0x3fa   :  { %1091 = vmatprep.subr.mxu0 %v2647_v37  ;;  %1162 = vmatprep.subr.mxu1 %v2650_v38 }
 0x3fb   :  { %1092 = vmatpush1.msra.mxu0 %v2653_v40  ;;  %1163 = vmatpush1.msra.mxu1 %v2656_v41 }
 0x3fc   :  { %1093 = vmatprep.subr.mxu0 %v2659_v42  ;;  %1164 = vmatprep.subr.mxu1 %v2662_v43 }
 0x3fd   :  { %1094 = vmatpush1.msra.mxu0 %v2665_v44  ;;  %1165 = vmatpush1.msra.mxu1 %v2668_v56 }
 0x3fe   :  { %1095 = vmatprep.subr.mxu0 %v2671_v55  ;;  %1166 = vmatprep.subr.mxu1 %v2674_v49 }
 0x3ff   :  { %1096 = vmatpush1.msra.mxu0 %v2677_v50  ;;  %1167 = vmatpush1.msra.mxu1 %v2680_v63 }
 0x400   :  { %1097 = vmatprep.subr.mxu0 %v2683_v61  ;;  %1168 = vmatprep.subr.mxu1 %v2686_v48 }
 0x401   :  { %1098 = vmatpush1.msra.mxu0 %v2689_v54  ;;  %1169 = vmatpush1.msra.mxu1 %v2692_v47 }
 0x402   :  { %1099 = vmatprep.subr.mxu0 %v2695_v52  ;;  %1170 = vmatprep.subr.mxu1 %v2698_v51 }
 0x403   :  { %1100 = vmatpush1.msra.mxu0 %v2701_v58  ;;  %1171 = vmatpush1.msra.mxu1 %v2704_v46 }
 0x404   :  { %1101 = vmatprep.subr.mxu0 %v2707_v57  ;;  %1172 = vmatprep.subr.mxu1 %v2710_v59  ;;  %v2725_v57 = vld [vmem:[#allocation2 + $0x40] sm:$0xff]  ;;  %v2728_v59 = vld [vmem:[#allocation2 + $0x50] sm:$0xff] }
 0x405   :  { %1102 = vmatpush1.msra.mxu0 %v2713_v3  ;;  %1173 = vmatpush1.msra.mxu1 %v2716_v1  ;;  %3208 = vst [vmem:[#allocation23_spill] sm:$0xff] %v2725_v57  ;;  %3209 = vst [vmem:[#allocation24_spill] sm:$0xff] %v2728_v59  ;;  %v2731_v3 = vld [vmem:[#allocation2 + $0x28] sm:$0xff]  ;;  %v2734_v1 = vld [vmem:[#allocation2 + $0x38] sm:$0xff] }
 0x406   :  { %1103 = vmatprep.subr.mxu0 %v2719_v0  ;;  %1174 = vmatprep.subr.mxu1 %v2722_v4  ;;  %3210 = vst [vmem:[#allocation25_spill] sm:$0xff] %v2731_v3  ;;  %3211 = vst [vmem:[#allocation26_spill] sm:$0xff] %v2734_v1  ;;  %v2737_v0 = vld [vmem:[#allocation2 + $0x20] sm:$0xff]  ;;  %v2740_v4 = vld [vmem:[#allocation2 + $0x30] sm:$0xff] }
 0x407   :  { %1104 = vmatpush1.msra.mxu0 %v2725_v57  ;;  %1175 = vmatpush1.msra.mxu1 %v2728_v59  ;;  %3212 = vst [vmem:[#allocation27_spill] sm:$0xff] %v2737_v0  ;;  %3213 = vst [vmem:[#allocation28_spill] sm:$0xff] %v2740_v4  ;;  %v2743_v57 = vld [vmem:[#allocation2 + $0x8] sm:$0xff]  ;;  %v2746_v59 = vld [vmem:[#allocation2 + $0x18] sm:$0xff] }
 0x408   :  { %1105 = vmatprep.subr.mxu0 %v2731_v3  ;;  %1176 = vmatprep.subr.mxu1 %v2734_v1  ;;  %3214 = vst [vmem:[#allocation29_spill] sm:$0xff] %v2743_v57  ;;  %3215 = vst [vmem:[#allocation30_spill] sm:$0xff] %v2746_v59  ;;  %v2749_v3 = vld [vmem:[#allocation2] sm:$0xff]  ;;  %v2753_v1 = vld [vmem:[#allocation2 + $0x10] sm:$0xff] }
 0x409   :  { %1106 = vmatpush1.msra.mxu0 %v2737_v0  ;;  %1177 = vmatpush1.msra.mxu1 %v2740_v4  ;;  %3216 = vst [vmem:[#allocation31_spill] sm:$0xff] %v2749_v3  ;;  %3217 = vst [vmem:[#allocation32_spill] sm:$0xff] %v2753_v1 }
 0x40a   :  { %1107 = vmatprep.subr.mxu0 %v2743_v57  ;;  %1178 = vmatprep.subr.mxu1 %v2746_v59  ;;  %v148_v57 = vpop.permute.xlu0 %147 }
 0x40b   :  { %1108 = vmatpush1.msra.mxu0 %v2749_v3  ;;  %1141 = vmatprep.mubr.f32.mxu0 %v3188_v24  ;;  %v202_v4 = vmul.f32 %v3192_v29, %v148_v57  ;;  %v203_v59 = vmul.f32 %v3193_v31, %v148_v57  ;;  %v204_v3 = vmul.f32 %v3195_v35, %v148_v57 }
 0x40c   :  { %1179 = vmatpush1.msra.mxu1 %v2753_v1  ;;  %1212 = vmatprep.mubr.f32.mxu1 %v3188_v24  ;;  %v205_v29 = vmul.f32 %v2310_v45, %v148_v57  ;;  %v3223_v57 = vld [vmem:[#allocation17_spill] sm:$0xff] }
 0x40d   :  { %1238 = vmatprep.subr.mxu0 %v2551_v26  ;;  %1309 = vmatprep.subr.mxu1 %v2554_v27  ;;  %v256_v0 = vadd.f32 %v3194_v33, %v202_v4  ;;  %v257_v51 = vadd.f32 %v3196_v39, %v203_v59  ;;  %v258_v26 = vadd.f32 %v3138_v60, %v204_v3 }
 0x40e   :  { %v259_v4 = vadd.f32 %v2313_v62, %v205_v29 }
 0x4ac   :  { %v982_v46 = vpop.f32.mrf.mxu0  ;;  %v1053_v1 = vpop.f32.mrf.mxu1 }
 0x4ad   :  { %v1058_v58 = vadd.f32 %v982_v46, %v256_v0  ;;  %v1060_v27 = vadd.f32 %v1053_v1, %v258_v26  ;;  %v3224_v1 = vld [vmem:[#allocation18_spill] sm:$0xff] }
 0x4ae   :  { %v984_v52 = vpop.f32.mrf.mxu0  ;;  %v1055_v31 = vpop.f32.mrf.mxu1 }
 0x4af   :  { %1785 = vtanh.f32 %v1058_v58  ;;  %v1059_v24 = vadd.f32 %v984_v52, %v257_v51  ;;  %v1061_v33 = vadd.f32 %v1055_v31, %v259_v4  ;;  %v3225_v4 = vld [vmem:[#allocation19_spill] sm:$0xff] }
 0x4b1   :  { %1787 = vtanh.f32 %v1059_v24 }
 0x4b2   :  { %1789 = vtanh.f32 %v1060_v27 }
 0x4b3   :  { %1791 = vtanh.f32 %v1061_v33  ;;  %v3218_v33 = vld [vmem:[#allocation12_spill] sm:$0xff] }
 0x4bc   :  { %v1786_v35 = vpop.eup %1785 }
 0x4bd   :  { %v1066_v47 = vadd.f32 1.0, %v1786_v35  ;;  %v3219_v35 = vld [vmem:[#allocation13_spill] sm:$0xff] }
 0x4be   :  { %v1788_v46 = vpop.eup %1787 }
 0x4bf   :  { %v1067_v0 = vmul.f32 0.5, %v1066_v47  ;;  %v1068_v59 = vadd.f32 1.0, %v1788_v46  ;;  %v1790_v58 = vpop.eup %1789  ;;  %v3222_v47 = vld [vmem:[#allocation16_spill] sm:$0xff] }
 0x4c0   :  { %v1792_v24 = vpop.eup %1791  ;;  %v3226_v46 = vld [vmem:[#allocation20_spill] sm:$0xff] }
 0x4c1   :  { %v1069_v39 = vmul.f32 0.5, %v1068_v59  ;;  %v1073_v52 = vmul.f32 %v1790_v58, %v1067_v0  ;;  %v1070_v27 = vadd.f32 1.0, %v1792_v24  ;;  %v3227_v0 = vld [vmem:[#allocation21_spill] sm:$0xff]  ;;  %v3228_v59 = vld [vmem:[#allocation22_spill] sm:$0xff]  ;;  %v3229_v58 = vld [vmem:[#allocation23_spill] sm:$0xff] }
 0x4c2   :  { %v3232_v24 = vld [vmem:[#allocation26_spill] sm:$0xff] }
 0x4c3   :  { %v1072_v3 = vmul.f32 %v1069_v39, %v2566_v53  ;;  %v1071_v51 = vmul.f32 0.5, %v1070_v27  ;;  %v3220_v39 = vld [vmem:[#allocation14_spill] sm:$0xff]  ;;  %v3221_v53 = vld [vmem:[#allocation15_spill] sm:$0xff] }
 0x4c4   :  { %v3233_v27 = vld [vmem:[#allocation27_spill] sm:$0xff] }
 0x4c5   :  { %v2768_v26 = vadd.f32 %v1073_v52, %v1072_v3  ;;  %v3230_v3 = vld [vmem:[#allocation24_spill] sm:$0xff]  ;;  %v3231_v52 = vld [vmem:[#allocation25_spill] sm:$0xff] }
 0x4c7   :  { %1793 = vtanh.f32 %v2768_v26 }
 0x4d4   :  { %v1794_v29 = vpop.eup %1793 }
 0x4d5   :  { %v1076_v31 = vmul.f32 %v1794_v29, %v1071_v51  ;;  %v3234_v51 = vld [vmem:[#allocation28_spill] sm:$0xff]  ;;  %v3235_v29 = vld [vmem:[#allocation29_spill] sm:$0xff] }
 0x4d7   :  { %1142 = vmatmul.mubr.f32.vlgmr.msra.gmra.mxu0 %v1076_v31  ;;  %1213 = vmatmul.mubr.f32.vlgmr.msra.gmra.mxu1 %v1076_v31  ;;  %v3236_v31 = vld [vmem:[#allocation30_spill] sm:$0xff] }
 0x4d8   :  { %1239 = vmatpush1.msra.mxu0 %v2569_v5  ;;  %1310 = vmatpush1.msra.mxu1 %v2572_v6 }
 0x4d9   :  { %1240 = vmatprep.subr.mxu0 %v2575_v2  ;;  %1311 = vmatprep.subr.mxu1 %v2578_v7 }
 0x4da   :  { %1241 = vmatpush1.msra.mxu0 %v2581_v8  ;;  %1312 = vmatpush1.msra.mxu1 %v2584_v9 }
 0x4db   :  { %1242 = vmatprep.subr.mxu0 %v2587_v10  ;;  %1313 = vmatprep.subr.mxu1 %v2590_v11 }
 0x4dc   :  { %1243 = vmatpush1.msra.mxu0 %v2593_v12  ;;  %1314 = vmatpush1.msra.mxu1 %v2596_v13 }
 0x4dd   :  { %1244 = vmatprep.subr.mxu0 %v2599_v14  ;;  %1315 = vmatprep.subr.mxu1 %v2602_v15 }
 0x4de   :  { %1245 = vmatpush1.msra.mxu0 %v2605_v16  ;;  %1316 = vmatpush1.msra.mxu1 %v2608_v17 }
 0x4df   :  { %1246 = vmatprep.subr.mxu0 %v2611_v18  ;;  %1317 = vmatprep.subr.mxu1 %v2614_v19 }
 0x4e0   :  { %1247 = vmatpush1.msra.mxu0 %v2617_v20  ;;  %1318 = vmatpush1.msra.mxu1 %v2620_v21 }
 0x4e1   :  { %1248 = vmatprep.subr.mxu0 %v2623_v22  ;;  %1319 = vmatprep.subr.mxu1 %v2626_v23 }
 0x4e2   :  { %1249 = vmatpush1.msra.mxu0 %v2629_v25  ;;  %1320 = vmatpush1.msra.mxu1 %v2632_v28 }
 0x4e3   :  { %1250 = vmatprep.subr.mxu0 %v2635_v30  ;;  %1321 = vmatprep.subr.mxu1 %v2638_v32 }
 0x4e4   :  { %1251 = vmatpush1.msra.mxu0 %v2641_v34  ;;  %1322 = vmatpush1.msra.mxu1 %v2644_v36 }
 0x4e5   :  { %1252 = vmatprep.subr.mxu0 %v2647_v37  ;;  %1323 = vmatprep.subr.mxu1 %v2650_v38 }
 0x4e6   :  { %1253 = vmatpush1.msra.mxu0 %v2653_v40  ;;  %1324 = vmatpush1.msra.mxu1 %v2656_v41 }
 0x4e7   :  { %1254 = vmatprep.subr.mxu0 %v2659_v42  ;;  %1325 = vmatprep.subr.mxu1 %v2662_v43 }
 0x4e8   :  { %1255 = vmatpush1.msra.mxu0 %v2665_v44  ;;  %1326 = vmatpush1.msra.mxu1 %v2668_v56 }
 0x4e9   :  { %1256 = vmatprep.subr.mxu0 %v2671_v55  ;;  %1327 = vmatprep.subr.mxu1 %v2674_v49 }
 0x4ea   :  { %1257 = vmatpush1.msra.mxu0 %v2677_v50  ;;  %1328 = vmatpush1.msra.mxu1 %v2680_v63 }
 0x4eb   :  { %1258 = vmatprep.subr.mxu0 %v2683_v61  ;;  %1329 = vmatprep.subr.mxu1 %v2686_v48 }
 0x4ec   :  { %1259 = vmatpush1.msra.mxu0 %v2689_v54  ;;  %1330 = vmatpush1.msra.mxu1 %v3218_v33 }
 0x4ed   :  { %1260 = vmatprep.subr.mxu0 %v3219_v35  ;;  %1331 = vmatprep.subr.mxu1 %v3220_v39 }
 0x4ee   :  { %1261 = vmatpush1.msra.mxu0 %v3221_v53  ;;  %1332 = vmatpush1.msra.mxu1 %v3222_v47  ;;  %v3246_v53 = vld [vmem:[#allocation38_spill] sm:$0xff] }
 0x4ef   :  { %1262 = vmatprep.subr.mxu0 %v3223_v57  ;;  %1333 = vmatprep.subr.mxu1 %v3224_v1 }
 0x4f0   :  { %1263 = vmatpush1.msra.mxu0 %v3225_v4  ;;  %1334 = vmatpush1.msra.mxu1 %v3226_v46  ;;  %v3237_v46 = vld [vmem:[#allocation31_spill] sm:$0xff] }
 0x4f1   :  { %1264 = vmatprep.subr.mxu0 %v3227_v0  ;;  %1335 = vmatprep.subr.mxu1 %v3228_v59  ;;  %v3238_v0 = vmov 0.0   ;;  %v3239_v59 = vld [vmem:[#allocation32_spill] sm:$0xff] }
 0x4f2   :  { %1265 = vmatpush1.msra.mxu0 %v3229_v58  ;;  %1336 = vmatpush1.msra.mxu1 %v3230_v3  ;;  %v3240_v3 = vld [vmem:[#allocation39_spill] sm:$0xff] }
 0x4f3   :  { %1266 = vmatprep.subr.mxu0 %v3231_v52  ;;  %1337 = vmatprep.subr.mxu1 %v3232_v24  ;;  %v3241_v52 = vld [vmem:[#allocation11_spill] sm:$0xff]  ;;  %v153_v24 = vpop.permute.xlu1 %152 }
 0x4f4   :  { %1267 = vmatpush1.msra.mxu0 %v3233_v27  ;;  %1338 = vmatpush1.msra.mxu1 %v3234_v51  ;;  %v3242_v27 = vld [vmem:[#allocation34_spill] sm:$0xff]  ;;  %v3243_v51 = vld [vmem:[#allocation35_spill] sm:$0xff] }
 0x4f5   :  { %1268 = vmatprep.subr.mxu0 %v3235_v29  ;;  %1339 = vmatprep.subr.mxu1 %v3236_v31  ;;  %v206_v58 = vmul.f32 %v3242_v27, %v153_v24  ;;  %v207_v4 = vmul.f32 %v3243_v51, %v153_v24  ;;  %v3244_v29 = vld [vmem:[#allocation36_spill] sm:$0xff]  ;;  %v3245_v31 = vld [vmem:[#allocation37_spill] sm:$0xff]  ;;  %v209_v27 = vmul.f32 %v2310_v45, %v153_v24 }
 0x4f6   :  { %1269 = vmatpush1.msra.mxu0 %v3237_v46  ;;  %1302 = vmatprep.mubr.f32.mxu0 %v3238_v0  ;;  %v208_v57 = vmul.f32 %v3245_v31, %v153_v24 }
 0x4f7   :  { %1340 = vmatpush1.msra.mxu1 %v3239_v59  ;;  %1373 = vmatprep.mubr.f32.mxu1 %v3238_v0  ;;  %v260_v1 = vadd.f32 %v3244_v29, %v206_v58  ;;  %v261_v39 = vadd.f32 %v3246_v53, %v207_v4  ;;  %v263_v58 = vadd.f32 %v2313_v62, %v209_v27 }
 0x4f8   :  { %1399 = vmatprep.subr.mxu0 %v3240_v3  ;;  %1470 = vmatprep.subr.mxu1 %v3241_v52  ;;  %v262_v3 = vadd.f32 %v3138_v60, %v208_v57 }
 0x597   :  { %v1143_v46 = vpop.f32.mrf.mxu0  ;;  %v1214_v59 = vpop.f32.mrf.mxu1 }
 0x598   :  { %v1219_v47 = vadd.f32 %v1143_v46, %v260_v1  ;;  %v1221_v52 = vadd.f32 %v1214_v59, %v262_v3 }
 0x599   :  { %v1145_v35 = vpop.f32.mrf.mxu0  ;;  %v1216_v51 = vpop.f32.mrf.mxu1 }
 0x59a   :  { %1795 = vtanh.f32 %v1219_v47  ;;  %v1220_v0 = vadd.f32 %v1145_v35, %v261_v39  ;;  %v1222_v29 = vadd.f32 %v1216_v51, %v263_v58 }
 0x59c   :  { %1797 = vtanh.f32 %v1220_v0 }
 0x59d   :  { %1799 = vtanh.f32 %v1221_v52 }
 0x59e   :  { %1801 = vtanh.f32 %v1222_v29 }
 0x5a7   :  { %v1796_v31 = vpop.eup %1795 }
 0x5a8   :  { %v1227_v33 = vadd.f32 1.0, %v1796_v31 }
 0x5a9   :  { %v1798_v1 = vpop.eup %1797 }
 0x5aa   :  { %v1228_v46 = vmul.f32 0.5, %v1227_v33  ;;  %v1229_v4 = vadd.f32 1.0, %v1798_v1  ;;  %v1800_v47 = vpop.eup %1799 }
 0x5ab   :  { %v1802_v0 = vpop.eup %1801 }
 0x5ac   :  { %v1230_v53 = vmul.f32 0.5, %v1229_v4  ;;  %v1234_v35 = vmul.f32 %v1800_v47, %v1228_v46  ;;  %v1231_v59 = vadd.f32 1.0, %v1802_v0 }
 0x5ae   :  { %v1233_v57 = vmul.f32 %v1230_v53, %v2768_v26  ;;  %v1232_v24 = vmul.f32 0.5, %v1231_v59 }
 0x5b0   :  { %v2846_v39 = vadd.f32 %v1234_v35, %v1233_v57 }
 0x5b2   :  { %1803 = vtanh.f32 %v2846_v39 }
 0x5bf   :  { %v1804_v27 = vpop.eup %1803 }
 0x5c0   :  { %v1237_v51 = vmul.f32 %v1804_v27, %v1232_v24 }
 0x5c2   :  { %1303 = vmatmul.mubr.f32.vlgmr.msra.gmra.mxu0 %v1237_v51  ;;  %1374 = vmatmul.mubr.f32.vlgmr.msra.gmra.mxu1 %v1237_v51  ;;  %v1575_v51 = vld [vmem:[#allocation5 + $0x78] sm:$0xff] }
 0x5c3   :  { %1400 = vmatpush1.msra.mxu0 %v2569_v5  ;;  %1471 = vmatpush1.msra.mxu1 %v2572_v6  ;;  %v3247_v5 = vld [vmem:[#allocation12_spill] sm:$0xff]  ;;  %v3248_v6 = vld [vmem:[#allocation13_spill] sm:$0xff] }
 0x5c4   :  { %1401 = vmatprep.subr.mxu0 %v2575_v2  ;;  %1472 = vmatprep.subr.mxu1 %v2578_v7  ;;  %v3249_v2 = vld [vmem:[#allocation14_spill] sm:$0xff]  ;;  %v3250_v7 = vld [vmem:[#allocation15_spill] sm:$0xff] }
 0x5c5   :  { %1402 = vmatpush1.msra.mxu0 %v2581_v8  ;;  %1473 = vmatpush1.msra.mxu1 %v2584_v9  ;;  %v3251_v8 = vld [vmem:[#allocation16_spill] sm:$0xff]  ;;  %v3252_v9 = vld [vmem:[#allocation17_spill] sm:$0xff] }
 0x5c6   :  { %1403 = vmatprep.subr.mxu0 %v2587_v10  ;;  %1474 = vmatprep.subr.mxu1 %v2590_v11  ;;  %v3253_v10 = vld [vmem:[#allocation18_spill] sm:$0xff]  ;;  %v3254_v11 = vld [vmem:[#allocation19_spill] sm:$0xff] }
 0x5c7   :  { %1404 = vmatpush1.msra.mxu0 %v2593_v12  ;;  %1475 = vmatpush1.msra.mxu1 %v2596_v13  ;;  %v3255_v12 = vld [vmem:[#allocation20_spill] sm:$0xff]  ;;  %v3256_v13 = vld [vmem:[#allocation21_spill] sm:$0xff] }
 0x5c8   :  { %1405 = vmatprep.subr.mxu0 %v2599_v14  ;;  %1476 = vmatprep.subr.mxu1 %v2602_v15  ;;  %v3257_v14 = vld [vmem:[#allocation22_spill] sm:$0xff]  ;;  %v3258_v15 = vld [vmem:[#allocation23_spill] sm:$0xff] }
 0x5c9   :  { %1406 = vmatpush1.msra.mxu0 %v2605_v16  ;;  %1477 = vmatpush1.msra.mxu1 %v2608_v17  ;;  %v3259_v16 = vld [vmem:[#allocation24_spill] sm:$0xff]  ;;  %v3260_v17 = vld [vmem:[#allocation25_spill] sm:$0xff] }
 0x5ca   :  { %1407 = vmatprep.subr.mxu0 %v2611_v18  ;;  %1478 = vmatprep.subr.mxu1 %v2614_v19  ;;  %v3261_v18 = vld [vmem:[#allocation26_spill] sm:$0xff]  ;;  %v3262_v19 = vld [vmem:[#allocation27_spill] sm:$0xff] }
 0x5cb   :  { %1408 = vmatpush1.msra.mxu0 %v2617_v20  ;;  %1479 = vmatpush1.msra.mxu1 %v2620_v21  ;;  %v3263_v20 = vld [vmem:[#allocation28_spill] sm:$0xff]  ;;  %v3264_v21 = vld [vmem:[#allocation29_spill] sm:$0xff] }
 0x5cc   :  { %1409 = vmatprep.subr.mxu0 %v2623_v22  ;;  %1480 = vmatprep.subr.mxu1 %v2626_v23  ;;  %v3265_v22 = vld [vmem:[#allocation30_spill] sm:$0xff]  ;;  %v3266_v23 = vld [vmem:[#allocation31_spill] sm:$0xff] }
 0x5cd   :  { %1410 = vmatpush1.msra.mxu0 %v2629_v25  ;;  %1481 = vmatpush1.msra.mxu1 %v2632_v28  ;;  %v3267_v25 = vmov 0.0   ;;  %v3268_v28 = vld [vmem:[#allocation32_spill] sm:$0xff] }
 0x5ce   :  { %1411 = vmatprep.subr.mxu0 %v2635_v30  ;;  %1482 = vmatprep.subr.mxu1 %v2638_v32  ;;  %v158_v30 = vpop.permute.xlu0 %157  ;;  %v3269_v32 = vld [vmem:[#allocation34_spill] sm:$0xff] }
 0x5cf   :  { %1412 = vmatpush1.msra.mxu0 %v2641_v34  ;;  %1483 = vmatpush1.msra.mxu1 %v2644_v36  ;;  %v210_v34 = vmul.f32 %v3269_v32, %v158_v30  ;;  %v3270_v36 = vld [vmem:[#allocation35_spill] sm:$0xff] }
 0x5d0   :  { %1413 = vmatprep.subr.mxu0 %v2647_v37  ;;  %1484 = vmatprep.subr.mxu1 %v2650_v38  ;;  %v211_v37 = vmul.f32 %v3270_v36, %v158_v30  ;;  %v3271_v38 = vld [vmem:[#allocation36_spill] sm:$0xff] }
 0x5d1   :  { %1414 = vmatpush1.msra.mxu0 %v2653_v40  ;;  %1485 = vmatpush1.msra.mxu1 %v2656_v41  ;;  %v264_v40 = vadd.f32 %v3271_v38, %v210_v34  ;;  %v3272_v41 = vld [vmem:[#allocation37_spill] sm:$0xff] }
 0x5d2   :  { %1415 = vmatprep.subr.mxu0 %v2659_v42  ;;  %1486 = vmatprep.subr.mxu1 %v2662_v43  ;;  %v212_v42 = vmul.f32 %v3272_v41, %v158_v30 }
 0x5d3   :  { %1416 = vmatpush1.msra.mxu0 %v2665_v44  ;;  %1487 = vmatpush1.msra.mxu1 %v2668_v56  ;;  %v3273_v56 = vld [vmem:[#allocation38_spill] sm:$0xff] }
 0x5d4   :  { %1417 = vmatprep.subr.mxu0 %v2671_v55  ;;  %1488 = vmatprep.subr.mxu1 %v2674_v49  ;;  %v265_v55 = vadd.f32 %v3273_v56, %v211_v37 }
 0x5d5   :  { %1418 = vmatpush1.msra.mxu0 %v2677_v50  ;;  %1489 = vmatpush1.msra.mxu1 %v2680_v63  ;;  %v266_v63 = vadd.f32 %v3138_v60, %v212_v42 }
 0x5d6   :  { %1419 = vmatprep.subr.mxu0 %v2683_v61  ;;  %1490 = vmatprep.subr.mxu1 %v2686_v48 }
 0x5d7   :  { %1420 = vmatpush1.msra.mxu0 %v2689_v54  ;;  %1491 = vmatpush1.msra.mxu1 %v3247_v5  ;;  %v213_v54 = vmul.f32 %v2310_v45, %v158_v30  ;;  %v1574_v5 = vld [vmem:[#allocation5 + $0x70] sm:$0xff] }
 0x5d8   :  { %1421 = vmatprep.subr.mxu0 %v3248_v6  ;;  %1492 = vmatprep.subr.mxu1 %v3249_v2  ;;  %v1572_v6 = vld [vmem:[#allocation5 + $0x60] sm:$0xff]  ;;  %v1571_v2 = vld [vmem:[#allocation5 + $0x58] sm:$0xff] }
 0x5d9   :  { %1422 = vmatpush1.msra.mxu0 %v3250_v7  ;;  %1493 = vmatpush1.msra.mxu1 %v3251_v8  ;;  %v267_v33 = vadd.f32 %v2313_v62, %v213_v54  ;;  %v1570_v7 = vld [vmem:[#allocation5 + $0x50] sm:$0xff]  ;;  %v1569_v8 = vld [vmem:[#allocation5 + $0x48] sm:$0xff] }
 0x5da   :  { %1423 = vmatprep.subr.mxu0 %v3252_v9  ;;  %1494 = vmatprep.subr.mxu1 %v3253_v10  ;;  %v1568_v9 = vld [vmem:[#allocation5 + $0x40] sm:$0xff]  ;;  %v1567_v10 = vld [vmem:[#allocation5 + $0x38] sm:$0xff] }
 0x5db   :  { %1424 = vmatpush1.msra.mxu0 %v3254_v11  ;;  %1495 = vmatpush1.msra.mxu1 %v3255_v12  ;;  %v1566_v11 = vld [vmem:[#allocation5 + $0x30] sm:$0xff]  ;;  %v1565_v12 = vld [vmem:[#allocation5 + $0x28] sm:$0xff] }
 0x5dc   :  { %1425 = vmatprep.subr.mxu0 %v3256_v13  ;;  %1496 = vmatprep.subr.mxu1 %v3257_v14  ;;  %v1564_v13 = vld [vmem:[#allocation5 + $0x20] sm:$0xff]  ;;  %v1563_v14 = vld [vmem:[#allocation5 + $0x18] sm:$0xff] }
 0x5dd   :  { %1426 = vmatpush1.msra.mxu0 %v3258_v15  ;;  %1497 = vmatpush1.msra.mxu1 %v3259_v16  ;;  %v1562_v15 = vld [vmem:[#allocation5 + $0x10] sm:$0xff]  ;;  %v1561_v16 = vld [vmem:[#allocation5 + $0x8] sm:$0xff] }
 0x5de   :  { %1427 = vmatprep.subr.mxu0 %v3260_v17  ;;  %1498 = vmatprep.subr.mxu1 %v3261_v18  ;;  %v1560_v17 = vld [vmem:[#allocation5] sm:$0xff]  ;;  %v163_v18 = vpop.permute.xlu1 %162 }
 0x5df   :  { %1428 = vmatpush1.msra.mxu0 %v3262_v19  ;;  %1499 = vmatpush1.msra.mxu1 %v3263_v20  ;;  %v214_v19 = vmul.f32 %v3269_v32, %v163_v18  ;;  %v215_v20 = vmul.f32 %v3270_v36, %v163_v18  ;;  %v217_v32 = vmul.f32 %v2310_v45, %v163_v18 }
 0x5e0   :  { %1429 = vmatprep.subr.mxu0 %v3264_v21  ;;  %1500 = vmatprep.subr.mxu1 %v3265_v22  ;;  %v216_v22 = vmul.f32 %v3272_v41, %v163_v18 }
 0x5e1   :  { %1430 = vmatpush1.msra.mxu0 %v3266_v23  ;;  %1463 = vmatprep.mubr.f32.mxu0 %v3267_v25  ;;  %v268_v21 = vadd.f32 %v3271_v38, %v214_v19  ;;  %v269_v30 = vadd.f32 %v3273_v56, %v215_v20  ;;  %v271_v38 = vadd.f32 %v2313_v62, %v217_v32  ;;  %v1680_v62 = vld [vmem:[%s2962_s5] ss:$0 sm:$0xff]  ;;  %s1933_s5 = scalar_lea.vmem %s1671_s29, 128 }
 0x5e2   :  { %1501 = vmatpush1.msra.mxu1 %v3268_v28  ;;  %1534 = vmatprep.mubr.f32.mxu1 %v3267_v25  ;;  %p1934_p10 = scmp.ne.s32.totalorder %s1671_s29, %s1933_s5  ;;  %p1939_p12 = scmp.lt.s32.totalorder %s1933_s5, %s1933_s5 }
 0x5e3   :  { %1698 = vmatprep.subr.mxu0 %v3267_v25 }
 0x5e4   :  { %p1940_p13 = por %p1939_p12, %p1938_p11 }
 0x5e6   :  { %p1941_p0 = pnand %p1940_p13, %p1934_p10 }
 0x682   :  { %v1304_v43 = vpop.f32.mrf.mxu0  ;;  %v1375_v49 = vpop.f32.mrf.mxu1 }
 0x683   :  { %v1380_v44 = vadd.f32 %v1304_v43, %v264_v40  ;;  %v1382_v48 = vadd.f32 %v1375_v49, %v266_v63  ;;  %v270_v40 = vadd.f32 %v3138_v60, %v216_v22 }
 0x684   :  { %v1306_v50 = vpop.f32.mrf.mxu0  ;;  %v1377_v26 = vpop.f32.mrf.mxu1 }
 0x685   :  { %1805 = vtanh.f32 %v1380_v44  ;;  %v1381_v61 = vadd.f32 %v1306_v50, %v265_v55  ;;  %v1383_v53 = vadd.f32 %v1377_v26, %v267_v33 }
 0x687   :  { %1807 = vtanh.f32 %v1381_v61 }
 0x688   :  { %1809 = vtanh.f32 %v1382_v48 }
 0x689   :  { %1811 = vtanh.f32 %v1383_v53 }
 0x692   :  { %v1806_v29 = vpop.eup %1805 }
 0x693   :  { %v1388_v31 = vadd.f32 1.0, %v1806_v29 }
 0x694   :  { %v1808_v3 = vpop.eup %1807 }
 0x695   :  { %v1389_v52 = vmul.f32 0.5, %v1388_v31  ;;  %v1390_v58 = vadd.f32 1.0, %v1808_v3  ;;  %v1810_v46 = vpop.eup %1809 }
 0x696   :  { %v1812_v35 = vpop.eup %1811 }
 0x697   :  { %v1391_v1 = vmul.f32 0.5, %v1390_v58  ;;  %v1395_v47 = vmul.f32 %v1810_v46, %v1389_v52  ;;  %v1392_v0 = vadd.f32 1.0, %v1812_v35 }
 0x699   :  { %v1394_v4 = vmul.f32 %v1391_v1, %v2846_v39  ;;  %v1393_v59 = vmul.f32 0.5, %v1392_v0  ;;  %v1573_v39 = vld [vmem:[#allocation5 + $0x68] sm:$0xff] }
 0x69b   :  { %v2923_v57 = vadd.f32 %v1395_v47, %v1394_v4 }
 0x69d   :  { %1813 = vtanh.f32 %v2923_v57 }
 0x6aa   :  { %v1814_v24 = vpop.eup %1813 }
 0x6ab   :  { %v1398_v27 = vmul.f32 %v1814_v24, %v1393_v59 }
 0x6ad   :  { %1464 = vmatmul.mubr.f32.vlgmr.msra.gmra.mxu0 %v1398_v27  ;;  %1535 = vmatmul.mubr.f32.vlgmr.msra.gmra.mxu1 %v1398_v27 }
 0x6ae   :  { %1699 = vmatpush3.msra.mxu0 %v1575_v51  ;;  %1730 = vmatprep.mubr.msk.f32.mxu0 %vm1967_vm0, %v3267_v25 }
 0x6af   :  { %1700 = vmatprep.subr.mxu0 %v3267_v25 }
 0x6b0   :  { %1701 = vmatpush3.msra.mxu0 %v1574_v5 }
 0x6b1   :  { %1702 = vmatprep.subr.mxu0 %v3267_v25 }
 0x6b2   :  { %1703 = vmatpush3.msra.mxu0 %v1573_v39 }
 0x6b3   :  { %1704 = vmatprep.subr.mxu0 %v3267_v25 }
 0x6b4   :  { %1705 = vmatpush3.msra.mxu0 %v1572_v6 }
 0x6b5   :  { %1706 = vmatprep.subr.mxu0 %v3267_v25 }
 0x6b6   :  { %1707 = vmatpush3.msra.mxu0 %v1571_v2 }
 0x6b7   :  { %1708 = vmatprep.subr.mxu0 %v3267_v25 }
 0x6b8   :  { %1709 = vmatpush3.msra.mxu0 %v1570_v7 }
 0x6b9   :  { %1710 = vmatprep.subr.mxu0 %v3267_v25 }
 0x6ba   :  { %1711 = vmatpush3.msra.mxu0 %v1569_v8 }
 0x6bb   :  { %1712 = vmatprep.subr.mxu0 %v3267_v25 }
 0x6bc   :  { %1713 = vmatpush3.msra.mxu0 %v1568_v9 }
 0x6bd   :  { %1714 = vmatprep.subr.mxu0 %v3267_v25 }
 0x6be   :  { %1715 = vmatpush3.msra.mxu0 %v1567_v10 }
 0x6bf   :  { %1716 = vmatprep.subr.mxu0 %v3267_v25 }
 0x6c0   :  { %1717 = vmatpush3.msra.mxu0 %v1566_v11 }
 0x6c1   :  { %1718 = vmatprep.subr.mxu0 %v3267_v25 }
 0x6c2   :  { %1719 = vmatpush3.msra.mxu0 %v1565_v12 }
 0x6c3   :  { %1720 = vmatprep.subr.mxu0 %v3267_v25 }
 0x6c4   :  { %1721 = vmatpush3.msra.mxu0 %v1564_v13 }
 0x6c5   :  { %1722 = vmatprep.subr.mxu0 %v3267_v25 }
 0x6c6   :  { %1723 = vmatpush3.msra.mxu0 %v1563_v14 }
 0x6c7   :  { %1724 = vmatprep.subr.mxu0 %v3267_v25 }
 0x6c8   :  { %1725 = vmatpush3.msra.mxu0 %v1562_v15 }
 0x6c9   :  { %1726 = vmatprep.subr.mxu0 %v3267_v25 }
 0x6ca   :  { %1727 = vmatpush3.msra.mxu0 %v1561_v16 }
 0x6cb   :  { %1728 = vmatprep.subr.mxu0 %v3267_v25 }
 0x6cc   :  { %1729 = vmatpush3.msra.mxu0 %v1560_v17 }
 0x76d   :  { %v1465_v23 = vpop.f32.mrf.mxu0  ;;  %v1536_v34 = vpop.f32.mrf.mxu1 }
 0x76e   :  { %v1541_v28 = vadd.f32 %v1465_v23, %v268_v21  ;;  %v1543_v42 = vadd.f32 %v1536_v34, %v270_v40 }
 0x76f   :  { %v1467_v37 = vpop.f32.mrf.mxu0  ;;  %v1538_v36 = vpop.f32.mrf.mxu1 }
 0x770   :  { %1815 = vtanh.f32 %v1541_v28  ;;  %v1542_v25 = vadd.f32 %v1467_v37, %v269_v30  ;;  %v1544_v43 = vadd.f32 %v1538_v36, %v271_v38 }
 0x772   :  { %1817 = vtanh.f32 %v1542_v25 }
 0x773   :  { %1819 = vtanh.f32 %v1543_v42 }
 0x774   :  { %1821 = vtanh.f32 %v1544_v43 }
 0x77d   :  { %v1816_v41 = vpop.eup %1815 }
 0x77e   :  { %v1549_v44 = vadd.f32 1.0, %v1816_v41 }
 0x77f   :  { %v1818_v55 = vpop.eup %1817 }
 0x780   :  { %v1550_v49 = vmul.f32 0.5, %v1549_v44  ;;  %v1551_v56 = vadd.f32 1.0, %v1818_v55  ;;  %v1820_v63 = vpop.eup %1819 }
 0x781   :  { %v1822_v54 = vpop.eup %1821 }
 0x782   :  { %v1552_v50 = vmul.f32 0.5, %v1551_v56  ;;  %v1556_v61 = vmul.f32 %v1820_v63, %v1550_v49  ;;  %v1553_v26 = vadd.f32 1.0, %v1822_v54 }
 0x784   :  { %v1555_v60 = vmul.f32 %v1552_v50, %v2923_v57  ;;  %v1554_v45 = vmul.f32 0.5, %v1553_v26 }
 0x786   :  { %v1557_v48 = vadd.f32 %v1556_v61, %v1555_v60 }
 0x788   :  { %1823 = vtanh.f32 %v1557_v48 }
 0x795   :  { %v1824_v33 = vpop.eup %1823 }
 0x796   :  { %v1559_v53 = vmul.f32 %v1824_v33, %v1554_v45 }
 0x798   :  { %1731 = vmatmul.mubr.f32.vlgmr.msra.gmra.mxu0 %v1559_v53 }
 0x858   :  { %v1649_v29 = vpop.f32.mrf.mxu0 }
 0x859   :  { %v1650_v31 = vadd.f32 %v1680_v62, %v1649_v29 }
 0x85a   :  { %v1732_v3 = vpop.f32.mrf.mxu0 }
 0x85b   :  { %1653 = vmax.xlane.f32.xlu0 %v1650_v31 }
 0x8e4   :  { %v1654_v52 = vpop.xlane.xlu0 %1653 }
 0x8e5   :  { %v1655_v58 = vsub.f32 %v1650_v31, %v1654_v52 }
 0x8e7   :  { %v1656_v1 = vmul.f32 1.442695, %v1655_v58 }
 0x8e9   :  { %1825 = vpow2.f32 %v1656_v1 }
 0x8f6   :  { %v1826_v46 = vpop.eup %1825 }
 0x8f7   :  { %1658 = vadd.xlane.f32.xlu1 %v1826_v46 }
 0x980   :  { %v1659_v4 = vpop.xlane.xlu1 %1658 }
 0x981   :  { %1827 = vlog2.f32 %v1659_v4 }
 0x98e   :  { %v1828_v47 = vpop.eup %1827 }
 0x98f   :  { %v1661_v57 = vmul.f32 0.6931472, %v1828_v47 }
 0x991   :  { %v1662_v35 = vsub.f32 %v1655_v58, %v1661_v57 }
 0x993   :  { %1663 = vst [vmem:[#allocation7] sm:$0xff] %v1662_v35 }
 0x994   :  { %1944 = shalt.err (!%p1941_p0)
}
 0x995   :  { %1673 = dma.vmem_to_hbm [thread:$0]  %s1671_s29, 128, %s2963_s6, [#allocation4]  }
 0x996   :  { %1957 = dma.done.wait [#allocation4], 128  }
 0x997   :  { %1958 = vsyncadd [#allocation4], 4294967168 }
 0x998   :  { %1677 = vsyncpa [#allocation3], 1 }
 0x999   :  { %1678 = vsyncpa [#allocation6], 1 }
 0x99a   :  { %1679 = vsyncpa [#allocation4], 1 }

</bundles_post_ra>
